<compile_context>
chip_gen: v7x
topology: tpu7x:2x2x1
jax: 0.10.0
libtpu: 0.0.40
codegen_flags: <defaults>
</compile_context>

<pallas_src>
import math
from functools import partial

import jax
import jax.numpy as jnp
from jax import lax
from jax.experimental import pallas as pl
from jax.experimental.pallas import tpu as pltpu


LN_EPS = 1e-5  # PyTorch nn.LayerNorm default


def _round_up(x, m):
    return (x + m - 1) // m * m


def _elementwise_dtype():
    """bf16 elementwise on chips with a bf16 VPU (v6e/v7x); f32 otherwise."""
    try:
        kind = jax.devices()[0].device_kind.lower()
    except Exception:
        return jnp.float32
    if any(v in kind for v in ("v2", "v3", "v4", "v5")):
        return jnp.float32      # no bf16 VALU on these generations
    return jnp.bfloat16          # v6e / v7x


def _vmem_cap_bytes():
    """Generation-aware VMEM ceiling (~85% of physical per-TensorCore VMEM)."""
    try:
        return int(0.85 * pltpu.get_tpu_info().vmem_capacity_bytes)
    except Exception:
        # Safe on every generation (v7x has 64 MiB physical per TC).
        return 48 << 20


def _choose_tm(M, tm):
    """Row-tile size: sublane aligned, and >= 2 grid steps when possible so a
    v7x megacore can shard the 'parallel' row axis across both TensorCores."""
    if M <= 8:
        return M                                   # full-dim block (any M ok)
    if M <= tm:
        return max(8, _round_up((M + 1) // 2, 8))  # split into ~2 tiles
    return tm


def _layernorm(x, gamma, beta):
    # One-pass variance (E[x^2] - E[x]^2); row reductions go to the XLU and
    # rsqrt to the EUP, so only the elementwise passes cost VPU slots.
    mu = jnp.mean(x, axis=-1, keepdims=True)
    var = jnp.mean(x * x, axis=-1, keepdims=True) - mu * mu
    inv = lax.rsqrt(jnp.maximum(var, 0.0) + LN_EPS)
    return (x - mu) * (inv * gamma) + beta


def mlp_proj_kernel(x_ref, ln1_g_ref, ln1_b_ref, w1_ref, b1_ref,
                    w2_ref, b2_ref, ln2_g_ref, ln2_b_ref, o_ref,
                    *, ew_dtype, approximate_gelu):
    x = x_ref[...].astype(jnp.float32)

    # LayerNorm(in_dim) in f32.
    h = _layernorm(x, ln1_g_ref[...], ln1_b_ref[...])

    # Linear(in_dim, in_dim): bf16 MXU operands, f32 accumulation.
    h = jnp.dot(h.astype(jnp.bfloat16), w1_ref[...],
                preferred_element_type=jnp.float32)

    # Bias add + GELU in ew_dtype (bf16 on v6e/v7x, f32 on v5e).  tanh GELU
    # lowers to the EUP (separate VLIW slot); exact erf is a VALU polynomial.
    h = h.astype(ew_dtype) + b1_ref[...]
    h = jax.nn.gelu(h, approximate=approximate_gelu)

    # Linear(in_dim, out_dim): bf16 MXU operands, f32 accumulation.
    # NOTE: for very large dims on v7x (resident bf16 weights > ~24-32 MiB),
    # stream w2 column-wise over an inner "arbitrary" axis instead of keeping
    # it fully resident; not needed at the sizes exercised here.
    y = jnp.dot(h.astype(jnp.bfloat16), w2_ref[...],
                preferred_element_type=jnp.float32) + b2_ref[...]

    # LayerNorm(out_dim) in f32.
    y = _layernorm(y, ln2_g_ref[...], ln2_b_ref[...])

    o_ref[...] = y.astype(o_ref.dtype)


def mlp_proj(image_embeds, params, *, tm=512, ew_dtype=None,
             approximate_gelu=True, out_dtype=None):
    """image_embeds: (B, L, in_dim) -> (B, L, out_dim)."""
    B, L, in_dim = image_embeds.shape
    out_dim = params["w2"].shape[1]
    if out_dtype is None:
        out_dtype = image_embeds.dtype   # pass out_dtype=jnp.bfloat16 to halve writeback
    if ew_dtype is None:
        ew_dtype = _elementwise_dtype()

    M = B * L
    tm_eff = _choose_tm(M, tm)
    grid = (pl.cdiv(M, tm_eff),)

    # No wrapper-side pad: Pallas handles the partial last row tile, and all
    # per-row math keeps any junk pad rows isolated from valid rows.
    x2d = image_embeds.reshape(M, in_dim)

    # bf16 weights: MXU peak is bf16 on all generations, and the resident
    # weight footprint halves (matters most on v7x's 64 MiB VMEM).
    w1 = params["w1"].astype(jnp.bfloat16)
    w2 = params["w2"].astype(jnp.bfloat16)
    ln1_g = params["ln1_g"].astype(jnp.float32)
    ln1_b = params["ln1_b"].astype(jnp.float32)
    b1 = params["b1"].astype(ew_dtype)          # bias consumed in ew_dtype
    b2 = params["b2"].astype(jnp.float32)
    ln2_g = params["ln2_g"].astype(jnp.float32)
    ln2_b = params["ln2_b"].astype(jnp.float32)

    x_bytes = x2d.dtype.itemsize
    o_bytes = jnp.dtype(out_dtype).itemsize
    param_bytes = ((w1.size + w2.size) * 2
                   + (2 * in_dim + 2 * out_dim) * 4
                   + in_dim * jnp.dtype(ew_dtype).itemsize + out_dim * 4)
    tile_bytes = 2 * tm_eff * (in_dim * x_bytes + out_dim * o_bytes)  # dbl-buffered rows
    vmem_cap = _vmem_cap_bytes()

    kernel = partial(mlp_proj_kernel, ew_dtype=ew_dtype,
                     approximate_gelu=approximate_gelu)

    def call(single_buffer_weights):
        resident = param_bytes if single_buffer_weights else 2 * param_bytes
        est = resident + tile_bytes + (8 << 20)           # headroom
        vmem_limit = int(min(max(est, 32 << 20), vmem_cap))

        def full(shape):
            # Constant block index -> single-buffer the weight/param blocks.
            if single_buffer_weights:
                return pl.BlockSpec(shape, lambda i: (0, 0),
                                    pipeline_mode=pl.Buffered(1))
            return pl.BlockSpec(shape, lambda i: (0, 0))

        return pl.pallas_call(
            kernel,
            out_shape=jax.ShapeDtypeStruct((M, out_dim), out_dtype),
            grid_spec=pltpu.PrefetchScalarGridSpec(
                num_scalar_prefetch=0,
                grid=grid,
                in_specs=[
                    pl.BlockSpec((tm_eff, in_dim), lambda i: (i, 0)),  # x rows
                    full((1, in_dim)),                 # ln1 gamma
                    full((1, in_dim)),                 # ln1 beta
                    full((in_dim, in_dim)),            # w1 (bf16)
                    full((1, in_dim)),                 # b1 (ew_dtype)
                    full((in_dim, out_dim)),           # w2 (bf16)
                    full((1, out_dim)),                # b2
                    full((1, out_dim)),                # ln2 gamma
                    full((1, out_dim)),                # ln2 beta
                ],
                out_specs=pl.BlockSpec((tm_eff, out_dim), lambda i: (i, 0)),
            ),
            compiler_params=pltpu.CompilerParams(
                dimension_semantics=("parallel",),     # megacore shards rows
                vmem_limit_bytes=vmem_limit),
        )(x2d, ln1_g, ln1_b, w1, b1, w2, b2, ln2_g, ln2_b)

    try:
        out = call(True)
    except Exception:
        # Fallback if this jax/Mosaic build rejects Buffered(1) input specs.
        out = call(False)

    return out.reshape(B, L, out_dim)


def mlp_proj_reference(image_embeds, params, *, matmul_dtype=jnp.float32,
                       ew_dtype=jnp.float32, approximate_gelu=False):
    """Plain-JAX reference of the PyTorch forward, for verification.

    matmul_dtype=bf16 / ew_dtype / approximate_gelu=True mirror the kernel's
    numerics; the defaults are the "ideal" fp32 exact-erf PyTorch forward.
    """
    x = image_embeds.astype(jnp.float32)
    h = _layernorm(x, params["ln1_g"], params["ln1_b"])
    h = jnp.dot(h.astype(matmul_dtype), params["w1"].astype(matmul_dtype),
                preferred_element_type=jnp.float32)
    h = h.astype(ew_dtype) + params["b1"].astype(ew_dtype)
    h = jax.nn.gelu(h, approximate=approximate_gelu)
    y = jnp.dot(h.astype(matmul_dtype), params["w2"].astype(matmul_dtype),
                preferred_element_type=jnp.float32) + params["b2"]
    y = _layernorm(y, params["ln2_g"], params["ln2_b"])
    return y.astype(image_embeds.dtype)


def init_params(key, in_dim, out_dim):
    ks = jax.random.split(key, 8)
    scale1 = 1.0 / math.sqrt(in_dim)
    # Linear weights stored as (in, out); equivalent to PyTorch's (out, in)^T.
    return {
        "ln1_g": 1.0 + 0.01 * jax.random.normal(ks[0], (1, in_dim), jnp.float32),
        "ln1_b": 0.01 * jax.random.normal(ks[1], (1, in_dim), jnp.float32),
        "w1": scale1 * jax.random.normal(ks[2], (in_dim, in_dim), jnp.float32),
        "b1": scale1 * jax.random.normal(ks[3], (1, in_dim), jnp.float32),
        "w2": scale1 * jax.random.normal(ks[4], (in_dim, out_dim), jnp.float32),
        "b2": scale1 * jax.random.normal(ks[5], (1, out_dim), jnp.float32),
        "ln2_g": 1.0 + 0.01 * jax.random.normal(ks[6], (1, out_dim), jnp.float32),
        "ln2_b": 0.01 * jax.random.normal(ks[7], (1, out_dim), jnp.float32),
    }


if __name__ == "__main__":
    # Small shapes, but lane-dense (last dims multiples of 128) so stores are
    # unmasked full-lane vst.  B*L = 16 -> two row tiles of 8 (megacore-friendly).
    B, L, in_dim, out_dim = 2, 8, 128, 256

    key = jax.random.PRNGKey(0)
    k_x, k_p = jax.random.split(key)
    image_embeds = jax.random.normal(k_x, (B, L, in_dim), jnp.float32)
    params = init_params(k_p, in_dim, out_dim)

    ew_dtype = _elementwise_dtype()

    out = jax.block_until_ready(mlp_proj(image_embeds, params, ew_dtype=ew_dtype))
    assert out.shape == (B, L, out_dim)
    assert bool(jnp.all(jnp.isfinite(out)))

    # Numerics-matched reference (bf16 MXU operands, same elementwise dtype,
    # tanh GELU -- mirrors the kernel exactly).
    ref_matched = mlp_proj_reference(image_embeds, params,
                                     matmul_dtype=jnp.bfloat16,
                                     ew_dtype=ew_dtype, approximate_gelu=True)
    diff_m = jnp.max(jnp.abs(out - ref_matched))
    assert jnp.allclose(out, ref_matched, atol=2e-2, rtol=2e-2), (
        f"matched-reference max abs diff {diff_m}")

    # Ideal fp32 exact-erf reference (what the PyTorch module computes in fp32);
    # looser tolerance because the kernel uses bf16 MXU/elementwise + tanh GELU.
    ref_f32 = mlp_proj_reference(image_embeds, params)
    diff_f = jnp.max(jnp.abs(out - ref_f32))
    assert jnp.allclose(out, ref_f32, atol=1e-1, rtol=1e-1), (
        f"fp32 max abs diff {diff_f}")

    # Ragged row count (M = 5): exercises the partial-tile / no-wrapper-pad path.
    x_odd = jax.random.normal(jax.random.PRNGKey(1), (1, 5, in_dim), jnp.float32)
    out_odd = jax.block_until_ready(mlp_proj(x_odd, params, ew_dtype=ew_dtype))
    ref_odd = mlp_proj_reference(x_odd, params, matmul_dtype=jnp.bfloat16,
                                 ew_dtype=ew_dtype, approximate_gelu=True)
    assert out_odd.shape == (1, 5, out_dim)
    assert jnp.allclose(out_odd, ref_odd, atol=2e-2, rtol=2e-2), (
        f"ragged max abs diff {jnp.max(jnp.abs(out_odd - ref_odd))}")

    print("KERNEL_OK")
</pallas_src>

<mosaic_0001>
module attributes {stable_mosaic.version = 11 : i64} {
  func.func @mlp_proj_kernel(%arg0: i32, %arg1: memref<8x128xf32, #tpu.memory_space<vmem>>, %arg2: memref<1x128xf32, #tpu.memory_space<vmem>>, %arg3: memref<1x128xf32, #tpu.memory_space<vmem>>, %arg4: memref<128x128xbf16, #tpu.memory_space<vmem>>, %arg5: memref<1x128xbf16, #tpu.memory_space<vmem>>, %arg6: memref<128x256xbf16, #tpu.memory_space<vmem>>, %arg7: memref<1x256xf32, #tpu.memory_space<vmem>>, %arg8: memref<1x256xf32, #tpu.memory_space<vmem>>, %arg9: memref<1x256xf32, #tpu.memory_space<vmem>>, %arg10: memref<8x256xf32, #tpu.memory_space<vmem>>) attributes {dimension_semantics = [#tpu.dimension_semantics<parallel>], iteration_bounds = array<i64: 2>, scalar_prefetch = 0 : i64, scratch_operands = 0 : i64, tpu.core_type = #tpu.core_type<tc>, window_params = [{transform_indices = @transform_0, window_bounds = array<i64: 8, 128>}, {pipeline_mode = #tpu.pipeline_mode<synchronous>, transform_indices = @transform_1, window_bounds = array<i64: 1, 128>}, {pipeline_mode = #tpu.pipeline_mode<synchronous>, transform_indices = @transform_2, window_bounds = array<i64: 1, 128>}, {pipeline_mode = #tpu.pipeline_mode<synchronous>, transform_indices = @transform_3, window_bounds = array<i64: 128, 128>}, {pipeline_mode = #tpu.pipeline_mode<synchronous>, transform_indices = @transform_4, window_bounds = array<i64: 1, 128>}, {pipeline_mode = #tpu.pipeline_mode<synchronous>, transform_indices = @transform_5, window_bounds = array<i64: 128, 256>}, {pipeline_mode = #tpu.pipeline_mode<synchronous>, transform_indices = @transform_6, window_bounds = array<i64: 1, 256>}, {pipeline_mode = #tpu.pipeline_mode<synchronous>, transform_indices = @transform_7, window_bounds = array<i64: 1, 256>}, {pipeline_mode = #tpu.pipeline_mode<synchronous>, transform_indices = @transform_8, window_bounds = array<i64: 1, 256>}, {transform_indices = @transform_9, window_bounds = array<i64: 8, 256>}]} {
    %c0 = arith.constant 0 : index
    %c0_0 = arith.constant 0 : index
    %0 = vector.load %arg1[%c0, %c0_0] : memref<8x128xf32, #tpu.memory_space<vmem>>, vector<8x128xf32>
    %c0_1 = arith.constant 0 : index
    %c0_2 = arith.constant 0 : index
    %1 = vector.load %arg2[%c0_1, %c0_2] : memref<1x128xf32, #tpu.memory_space<vmem>>, vector<1x128xf32>
    %c0_3 = arith.constant 0 : index
    %c0_4 = arith.constant 0 : index
    %2 = vector.load %arg3[%c0_3, %c0_4] : memref<1x128xf32, #tpu.memory_space<vmem>>, vector<1x128xf32>
    %cst = arith.constant dense<0.000000e+00> : vector<8xf32>
    %3 = vector.multi_reduction <add>, %0, %cst [1] : vector<8x128xf32> to vector<8xf32>
    %4 = vector.shape_cast %3 : vector<8xf32> to vector<8x1xf32>
    %cst_5 = arith.constant 1.280000e+02 : f32
    %5 = vector.broadcast %cst_5 : f32 to vector<8x1xf32>
    %6 = arith.divf %4, %5 : vector<8x1xf32>
    %7 = arith.mulf %0, %0 : vector<8x128xf32>
    %cst_6 = arith.constant dense<0.000000e+00> : vector<8xf32>
    %8 = vector.multi_reduction <add>, %7, %cst_6 [1] : vector<8x128xf32> to vector<8xf32>
    %9 = vector.shape_cast %8 : vector<8xf32> to vector<8x1xf32>
    %cst_7 = arith.constant 1.280000e+02 : f32
    %10 = vector.broadcast %cst_7 : f32 to vector<8x1xf32>
    %11 = arith.divf %9, %10 : vector<8x1xf32>
    %12 = arith.mulf %6, %6 : vector<8x1xf32>
    %13 = arith.subf %11, %12 : vector<8x1xf32>
    %cst_8 = arith.constant 0.000000e+00 : f32
    %14 = vector.broadcast %cst_8 : f32 to vector<8x1xf32>
    %15 = arith.maximumf %13, %14 : vector<8x1xf32>
    %cst_9 = arith.constant 9.99999974E-6 : f32
    %16 = vector.broadcast %cst_9 : f32 to vector<8x1xf32>
    %17 = arith.addf %15, %16 : vector<8x1xf32>
    %18 = math.rsqrt %17 : vector<8x1xf32>
    %19 = vector.broadcast %6 : vector<8x1xf32> to vector<8x128xf32>
    %20 = arith.subf %0, %19 : vector<8x128xf32>
    %21 = vector.broadcast %18 : vector<8x1xf32> to vector<8x128xf32>
    %22 = vector.broadcast %1 : vector<1x128xf32> to vector<8x128xf32>
    %23 = arith.mulf %21, %22 : vector<8x128xf32>
    %24 = arith.mulf %20, %23 : vector<8x128xf32>
    %25 = vector.broadcast %2 : vector<1x128xf32> to vector<8x128xf32>
    %26 = arith.addf %24, %25 : vector<8x128xf32>
    %27 = arith.truncf %26 : vector<8x128xf32> to vector<8x128xbf16>
    %c0_10 = arith.constant 0 : index
    %c0_11 = arith.constant 0 : index
    %28 = vector.load %arg4[%c0_10, %c0_11] : memref<128x128xbf16, #tpu.memory_space<vmem>>, vector<128x128xbf16>
    %cst_12 = arith.constant dense<0.000000e+00> : vector<8x128xf32>
    %29 = tpu.matmul %27, %28, %cst_12 {dimension_numbers = #tpu.dot_dimension_numbers<[1], [0], [0], [1], [0, 0, 1, 1], [], []>} : vector<8x128xbf16>, vector<128x128xbf16>, vector<8x128xf32> -> vector<8x128xf32>
    %30 = arith.truncf %29 : vector<8x128xf32> to vector<8x128xbf16>
    %c0_13 = arith.constant 0 : index
    %c0_14 = arith.constant 0 : index
    %31 = vector.load %arg5[%c0_13, %c0_14] : memref<1x128xbf16, #tpu.memory_space<vmem>>, vector<1x128xbf16>
    %32 = vector.broadcast %31 : vector<1x128xbf16> to vector<8x128xbf16>
    %33 = arith.addf %30, %32 : vector<8x128xbf16>
    %34 = arith.mulf %33, %33 : vector<8x128xbf16>
    %35 = arith.mulf %33, %34 : vector<8x128xbf16>
    %cst_15 = arith.constant 4.467770e-02 : bf16
    %36 = vector.broadcast %cst_15 : bf16 to vector<8x128xbf16>
    %37 = arith.mulf %36, %35 : vector<8x128xbf16>
    %38 = arith.addf %33, %37 : vector<8x128xbf16>
    %cst_16 = arith.constant 7.968750e-01 : bf16
    %39 = vector.broadcast %cst_16 : bf16 to vector<8x128xbf16>
    %40 = arith.mulf %39, %38 : vector<8x128xbf16>
    %41 = math.tanh %40 : vector<8x128xbf16>
    %cst_17 = arith.constant 1.000000e+00 : bf16
    %42 = vector.broadcast %cst_17 : bf16 to vector<8x128xbf16>
    %43 = arith.addf %42, %41 : vector<8x128xbf16>
    %cst_18 = arith.constant 5.000000e-01 : bf16
    %44 = vector.broadcast %cst_18 : bf16 to vector<8x128xbf16>
    %45 = arith.mulf %44, %43 : vector<8x128xbf16>
    %46 = arith.mulf %33, %45 : vector<8x128xbf16>
    %c0_19 = arith.constant 0 : index
    %c0_20 = arith.constant 0 : index
    %47 = vector.load %arg6[%c0_19, %c0_20] : memref<128x256xbf16, #tpu.memory_space<vmem>>, vector<128x256xbf16>
    %cst_21 = arith.constant dense<0.000000e+00> : vector<8x256xf32>
    %48 = tpu.matmul %46, %47, %cst_21 {dimension_numbers = #tpu.dot_dimension_numbers<[1], [0], [0], [1], [0, 0, 1, 1], [], []>} : vector<8x128xbf16>, vector<128x256xbf16>, vector<8x256xf32> -> vector<8x256xf32>
    %c0_22 = arith.constant 0 : index
    %c0_23 = arith.constant 0 : index
    %49 = vector.load %arg7[%c0_22, %c0_23] : memref<1x256xf32, #tpu.memory_space<vmem>>, vector<1x256xf32>
    %50 = vector.broadcast %49 : vector<1x256xf32> to vector<8x256xf32>
    %51 = arith.addf %48, %50 : vector<8x256xf32>
    %c0_24 = arith.constant 0 : index
    %c0_25 = arith.constant 0 : index
    %52 = vector.load %arg8[%c0_24, %c0_25] : memref<1x256xf32, #tpu.memory_space<vmem>>, vector<1x256xf32>
    %c0_26 = arith.constant 0 : index
    %c0_27 = arith.constant 0 : index
    %53 = vector.load %arg9[%c0_26, %c0_27] : memref<1x256xf32, #tpu.memory_space<vmem>>, vector<1x256xf32>
    %cst_28 = arith.constant dense<0.000000e+00> : vector<8xf32>
    %54 = vector.multi_reduction <add>, %51, %cst_28 [1] : vector<8x256xf32> to vector<8xf32>
    %55 = vector.shape_cast %54 : vector<8xf32> to vector<8x1xf32>
    %cst_29 = arith.constant 2.560000e+02 : f32
    %56 = vector.broadcast %cst_29 : f32 to vector<8x1xf32>
    %57 = arith.divf %55, %56 : vector<8x1xf32>
    %58 = arith.mulf %51, %51 : vector<8x256xf32>
    %cst_30 = arith.constant dense<0.000000e+00> : vector<8xf32>
    %59 = vector.multi_reduction <add>, %58, %cst_30 [1] : vector<8x256xf32> to vector<8xf32>
    %60 = vector.shape_cast %59 : vector<8xf32> to vector<8x1xf32>
    %cst_31 = arith.constant 2.560000e+02 : f32
    %61 = vector.broadcast %cst_31 : f32 to vector<8x1xf32>
    %62 = arith.divf %60, %61 : vector<8x1xf32>
    %63 = arith.mulf %57, %57 : vector<8x1xf32>
    %64 = arith.subf %62, %63 : vector<8x1xf32>
    %cst_32 = arith.constant 0.000000e+00 : f32
    %65 = vector.broadcast %cst_32 : f32 to vector<8x1xf32>
    %66 = arith.maximumf %64, %65 : vector<8x1xf32>
    %cst_33 = arith.constant 9.99999974E-6 : f32
    %67 = vector.broadcast %cst_33 : f32 to vector<8x1xf32>
    %68 = arith.addf %66, %67 : vector<8x1xf32>
    %69 = math.rsqrt %68 : vector<8x1xf32>
    %70 = vector.broadcast %57 : vector<8x1xf32> to vector<8x256xf32>
    %71 = arith.subf %51, %70 : vector<8x256xf32>
    %72 = vector.broadcast %69 : vector<8x1xf32> to vector<8x256xf32>
    %73 = vector.broadcast %52 : vector<1x256xf32> to vector<8x256xf32>
    %74 = arith.mulf %72, %73 : vector<8x256xf32>
    %75 = arith.mulf %71, %74 : vector<8x256xf32>
    %76 = vector.broadcast %53 : vector<1x256xf32> to vector<8x256xf32>
    %77 = arith.addf %75, %76 : vector<8x256xf32>
    %c0_34 = arith.constant 0 : index
    %c0_35 = arith.constant 0 : index
    %78 = vector.load %arg10[%c0_34, %c0_35] : memref<8x256xf32, #tpu.memory_space<vmem>>, vector<8x256xf32>
    tpu.vector_store %arg10[%c0_34, %c0_35], %77 {strides = array<i32>} : memref<8x256xf32, #tpu.memory_space<vmem>>, vector<8x256xf32>,
    return
  }
  func.func @transform_0(%arg0: i32) -> (i32, i32) {
    %c0_i32 = arith.constant 0 : i32
    %c0_i32_0 = arith.constant 0 : i32
    return %arg0, %c0_i32 : i32, i32
  }
  func.func @transform_1(%arg0: i32) -> (i32, i32) {
    %c0_i32 = arith.constant 0 : i32
    %c0_i32_0 = arith.constant 0 : i32
    %c0_i32_1 = arith.constant 0 : i32
    return %c0_i32, %c0_i32_0 : i32, i32
  }
  func.func @transform_2(%arg0: i32) -> (i32, i32) {
    %c0_i32 = arith.constant 0 : i32
    %c0_i32_0 = arith.constant 0 : i32
    %c0_i32_1 = arith.constant 0 : i32
    return %c0_i32, %c0_i32_0 : i32, i32
  }
  func.func @transform_3(%arg0: i32) -> (i32, i32) {
    %c0_i32 = arith.constant 0 : i32
    %c0_i32_0 = arith.constant 0 : i32
    %c0_i32_1 = arith.constant 0 : i32
    return %c0_i32, %c0_i32_0 : i32, i32
  }
  func.func @transform_4(%arg0: i32) -> (i32, i32) {
    %c0_i32 = arith.constant 0 : i32
    %c0_i32_0 = arith.constant 0 : i32
    %c0_i32_1 = arith.constant 0 : i32
    return %c0_i32, %c0_i32_0 : i32, i32
  }
  func.func @transform_5(%arg0: i32) -> (i32, i32) {
    %c0_i32 = arith.constant 0 : i32
    %c0_i32_0 = arith.constant 0 : i32
    %c0_i32_1 = arith.constant 0 : i32
    return %c0_i32, %c0_i32_0 : i32, i32
  }
  func.func @transform_6(%arg0: i32) -> (i32, i32) {
    %c0_i32 = arith.constant 0 : i32
    %c0_i32_0 = arith.constant 0 : i32
    %c0_i32_1 = arith.constant 0 : i32
    return %c0_i32, %c0_i32_0 : i32, i32
  }
  func.func @transform_7(%arg0: i32) -> (i32, i32) {
    %c0_i32 = arith.constant 0 : i32
    %c0_i32_0 = arith.constant 0 : i32
    %c0_i32_1 = arith.constant 0 : i32
    return %c0_i32, %c0_i32_0 : i32, i32
  }
  func.func @transform_8(%arg0: i32) -> (i32, i32) {
    %c0_i32 = arith.constant 0 : i32
    %c0_i32_0 = arith.constant 0 : i32
    %c0_i32_1 = arith.constant 0 : i32
    return %c0_i32, %c0_i32_0 : i32, i32
  }
  func.func @transform_9(%arg0: i32) -> (i32, i32) {
    %c0_i32 = arith.constant 0 : i32
    %c0_i32_0 = arith.constant 0 : i32
    return %arg0, %c0_i32 : i32, i32
  }
}

module attributes {stable_mosaic.version = 11 : i64} {
  func.func @mlp_proj_kernel(%arg0: i32, %arg1: memref<8x128xf32, #tpu.memory_space<vmem>>, %arg2: memref<1x128xf32, #tpu.memory_space<vmem>>, %arg3: memref<1x128xf32, #tpu.memory_space<vmem>>, %arg4: memref<128x128xbf16, #tpu.memory_space<vmem>>, %arg5: memref<1x128xbf16, #tpu.memory_space<vmem>>, %arg6: memref<128x256xbf16, #tpu.memory_space<vmem>>, %arg7: memref<1x256xf32, #tpu.memory_space<vmem>>, %arg8: memref<1x256xf32, #tpu.memory_space<vmem>>, %arg9: memref<1x256xf32, #tpu.memory_space<vmem>>, %arg10: memref<8x256xf32, #tpu.memory_space<vmem>>) attributes {dimension_semantics = [#tpu.dimension_semantics<parallel>], iteration_bounds = array<i64: 2>, scalar_prefetch = 0 : i64, scratch_operands = 0 : i64, tpu.core_type = #tpu.core_type<tc>, window_params = [{transform_indices = @transform_0, window_bounds = array<i64: 8, 128>}, {pipeline_mode = #tpu.pipeline_mode<synchronous>, transform_indices = @transform_1, window_bounds = array<i64: 1, 128>}, {pipeline_mode = #tpu.pipeline_mode<synchronous>, transform_indices = @transform_2, window_bounds = array<i64: 1, 128>}, {pipeline_mode = #tpu.pipeline_mode<synchronous>, transform_indices = @transform_3, window_bounds = array<i64: 128, 128>}, {pipeline_mode = #tpu.pipeline_mode<synchronous>, transform_indices = @transform_4, window_bounds = array<i64: 1, 128>}, {pipeline_mode = #tpu.pipeline_mode<synchronous>, transform_indices = @transform_5, window_bounds = array<i64: 128, 256>}, {pipeline_mode = #tpu.pipeline_mode<synchronous>, transform_indices = @transform_6, window_bounds = array<i64: 1, 256>}, {pipeline_mode = #tpu.pipeline_mode<synchronous>, transform_indices = @transform_7, window_bounds = array<i64: 1, 256>}, {pipeline_mode = #tpu.pipeline_mode<synchronous>, transform_indices = @transform_8, window_bounds = array<i64: 1, 256>}, {transform_indices = @transform_9, window_bounds = array<i64: 8, 256>}]} {
    %c0 = arith.constant 0 : index
    %c0_0 = arith.constant 0 : index
    %0 = vector.load %arg1[%c0, %c0_0] : memref<8x128xf32, #tpu.memory_space<vmem>>, vector<8x128xf32>
    %c0_1 = arith.constant 0 : index
    %c0_2 = arith.constant 0 : index
    %1 = vector.load %arg2[%c0_1, %c0_2] : memref<1x128xf32, #tpu.memory_space<vmem>>, vector<1x128xf32>
    %c0_3 = arith.constant 0 : index
    %c0_4 = arith.constant 0 : index
    %2 = vector.load %arg3[%c0_3, %c0_4] : memref<1x128xf32, #tpu.memory_space<vmem>>, vector<1x128xf32>
    %cst = arith.constant dense<0.000000e+00> : vector<8xf32>
    %3 = vector.multi_reduction <add>, %0, %cst [1] : vector<8x128xf32> to vector<8xf32>
    %4 = vector.shape_cast %3 : vector<8xf32> to vector<8x1xf32>
    %cst_5 = arith.constant 1.280000e+02 : f32
    %5 = vector.broadcast %cst_5 : f32 to vector<8x1xf32>
    %6 = arith.divf %4, %5 : vector<8x1xf32>
    %7 = arith.mulf %0, %0 : vector<8x128xf32>
    %cst_6 = arith.constant dense<0.000000e+00> : vector<8xf32>
    %8 = vector.multi_reduction <add>, %7, %cst_6 [1] : vector<8x128xf32> to vector<8xf32>
    %9 = vector.shape_cast %8 : vector<8xf32> to vector<8x1xf32>
    %cst_7 = arith.constant 1.280000e+02 : f32
    %10 = vector.broadcast %cst_7 : f32 to vector<8x1xf32>
    %11 = arith.divf %9, %10 : vector<8x1xf32>
    %12 = arith.mulf %6, %6 : vector<8x1xf32>
    %13 = arith.subf %11, %12 : vector<8x1xf32>
    %cst_8 = arith.constant 0.000000e+00 : f32
    %14 = vector.broadcast %cst_8 : f32 to vector<8x1xf32>
    %15 = arith.maximumf %13, %14 : vector<8x1xf32>
    %cst_9 = arith.constant 9.99999974E-6 : f32
    %16 = vector.broadcast %cst_9 : f32 to vector<8x1xf32>
    %17 = arith.addf %15, %16 : vector<8x1xf32>
    %18 = math.rsqrt %17 : vector<8x1xf32>
    %19 = vector.broadcast %6 : vector<8x1xf32> to vector<8x128xf32>
    %20 = arith.subf %0, %19 : vector<8x128xf32>
    %21 = vector.broadcast %18 : vector<8x1xf32> to vector<8x128xf32>
    %22 = vector.broadcast %1 : vector<1x128xf32> to vector<8x128xf32>
    %23 = arith.mulf %21, %22 : vector<8x128xf32>
    %24 = arith.mulf %20, %23 : vector<8x128xf32>
    %25 = vector.broadcast %2 : vector<1x128xf32> to vector<8x128xf32>
    %26 = arith.addf %24, %25 : vector<8x128xf32>
    %27 = arith.truncf %26 : vector<8x128xf32> to vector<8x128xbf16>
    %c0_10 = arith.constant 0 : index
    %c0_11 = arith.constant 0 : index
    %28 = vector.load %arg4[%c0_10, %c0_11] : memref<128x128xbf16, #tpu.memory_space<vmem>>, vector<128x128xbf16>
    %cst_12 = arith.constant dense<0.000000e+00> : vector<8x128xf32>
    %29 = tpu.matmul %27, %28, %cst_12 {dimension_numbers = #tpu.dot_dimension_numbers<[1], [0], [0], [1], [0, 0, 1, 1], [], []>} : vector<8x128xbf16>, vector<128x128xbf16>, vector<8x128xf32> -> vector<8x128xf32>
    %30 = arith.truncf %29 : vector<8x128xf32> to vector<8x128xbf16>
    %c0_13 = arith.constant 0 : index
    %c0_14 = arith.constant 0 : index
    %31 = vector.load %arg5[%c0_13, %c0_14] : memref<1x128xbf16, #tpu.memory_space<vmem>>, vector<1x128xbf16>
    %32 = vector.broadcast %31 : vector<1x128xbf16> to vector<8x128xbf16>
    %33 = arith.addf %30, %32 : vector<8x128xbf16>
    %34 = arith.mulf %33, %33 : vector<8x128xbf16>
    %35 = arith.mulf %33, %34 : vector<8x128xbf16>
    %cst_15 = arith.constant 4.467770e-02 : bf16
    %36 = vector.broadcast %cst_15 : bf16 to vector<8x128xbf16>
    %37 = arith.mulf %36, %35 : vector<8x128xbf16>
    %38 = arith.addf %33, %37 : vector<8x128xbf16>
    %cst_16 = arith.constant 7.968750e-01 : bf16
    %39 = vector.broadcast %cst_16 : bf16 to vector<8x128xbf16>
    %40 = arith.mulf %39, %38 : vector<8x128xbf16>
    %41 = math.tanh %40 : vector<8x128xbf16>
    %cst_17 = arith.constant 1.000000e+00 : bf16
    %42 = vector.broadcast %cst_17 : bf16 to vector<8x128xbf16>
    %43 = arith.addf %42, %41 : vector<8x128xbf16>
    %cst_18 = arith.constant 5.000000e-01 : bf16
    %44 = vector.broadcast %cst_18 : bf16 to vector<8x128xbf16>
    %45 = arith.mulf %44, %43 : vector<8x128xbf16>
    %46 = arith.mulf %33, %45 : vector<8x128xbf16>
    %c0_19 = arith.constant 0 : index
    %c0_20 = arith.constant 0 : index
    %47 = vector.load %arg6[%c0_19, %c0_20] : memref<128x256xbf16, #tpu.memory_space<vmem>>, vector<128x256xbf16>
    %cst_21 = arith.constant dense<0.000000e+00> : vector<8x256xf32>
    %48 = tpu.matmul %46, %47, %cst_21 {dimension_numbers = #tpu.dot_dimension_numbers<[1], [0], [0], [1], [0, 0, 1, 1], [], []>} : vector<8x128xbf16>, vector<128x256xbf16>, vector<8x256xf32> -> vector<8x256xf32>
    %c0_22 = arith.constant 0 : index
    %c0_23 = arith.constant 0 : index
    %49 = vector.load %arg7[%c0_22, %c0_23] : memref<1x256xf32, #tpu.memory_space<vmem>>, vector<1x256xf32>
    %50 = vector.broadcast %49 : vector<1x256xf32> to vector<8x256xf32>
    %51 = arith.addf %48, %50 : vector<8x256xf32>
    %c0_24 = arith.constant 0 : index
    %c0_25 = arith.constant 0 : index
    %52 = vector.load %arg8[%c0_24, %c0_25] : memref<1x256xf32, #tpu.memory_space<vmem>>, vector<1x256xf32>
    %c0_26 = arith.constant 0 : index
    %c0_27 = arith.constant 0 : index
    %53 = vector.load %arg9[%c0_26, %c0_27] : memref<1x256xf32, #tpu.memory_space<vmem>>, vector<1x256xf32>
    %cst_28 = arith.constant dense<0.000000e+00> : vector<8xf32>
    %54 = vector.multi_reduction <add>, %51, %cst_28 [1] : vector<8x256xf32> to vector<8xf32>
    %55 = vector.shape_cast %54 : vector<8xf32> to vector<8x1xf32>
    %cst_29 = arith.constant 2.560000e+02 : f32
    %56 = vector.broadcast %cst_29 : f32 to vector<8x1xf32>
    %57 = arith.divf %55, %56 : vector<8x1xf32>
    %58 = arith.mulf %51, %51 : vector<8x256xf32>
    %cst_30 = arith.constant dense<0.000000e+00> : vector<8xf32>
    %59 = vector.multi_reduction <add>, %58, %cst_30 [1] : vector<8x256xf32> to vector<8xf32>
    %60 = vector.shape_cast %59 : vector<8xf32> to vector<8x1xf32>
    %cst_31 = arith.constant 2.560000e+02 : f32
    %61 = vector.broadcast %cst_31 : f32 to vector<8x1xf32>
    %62 = arith.divf %60, %61 : vector<8x1xf32>
    %63 = arith.mulf %57, %57 : vector<8x1xf32>
    %64 = arith.subf %62, %63 : vector<8x1xf32>
    %cst_32 = arith.constant 0.000000e+00 : f32
    %65 = vector.broadcast %cst_32 : f32 to vector<8x1xf32>
    %66 = arith.maximumf %64, %65 : vector<8x1xf32>
    %cst_33 = arith.constant 9.99999974E-6 : f32
    %67 = vector.broadcast %cst_33 : f32 to vector<8x1xf32>
    %68 = arith.addf %66, %67 : vector<8x1xf32>
    %69 = math.rsqrt %68 : vector<8x1xf32>
    %70 = vector.broadcast %57 : vector<8x1xf32> to vector<8x256xf32>
    %71 = arith.subf %51, %70 : vector<8x256xf32>
    %72 = vector.broadcast %69 : vector<8x1xf32> to vector<8x256xf32>
    %73 = vector.broadcast %52 : vector<1x256xf32> to vector<8x256xf32>
    %74 = arith.mulf %72, %73 : vector<8x256xf32>
    %75 = arith.mulf %71, %74 : vector<8x256xf32>
    %76 = vector.broadcast %53 : vector<1x256xf32> to vector<8x256xf32>
    %77 = arith.addf %75, %76 : vector<8x256xf32>
    %c0_34 = arith.constant 0 : index
    %c0_35 = arith.constant 0 : index
    %78 = vector.load %arg10[%c0_34, %c0_35] : memref<8x256xf32, #tpu.memory_space<vmem>>, vector<8x256xf32>
    tpu.vector_store %arg10[%c0_34, %c0_35], %77 {strides = array<i32>} : memref<8x256xf32, #tpu.memory_space<vmem>>, vector<8x256xf32>,
    return
  }
  func.func @transform_0(%arg0: i32) -> (i32, i32) {
    %c0_i32 = arith.constant 0 : i32
    %c0_i32_0 = arith.constant 0 : i32
    return %arg0, %c0_i32 : i32, i32
  }
  func.func @transform_1(%arg0: i32) -> (i32, i32) {
    %c0_i32 = arith.constant 0 : i32
    %c0_i32_0 = arith.constant 0 : i32
    %c0_i32_1 = arith.constant 0 : i32
    return %c0_i32, %c0_i32_0 : i32, i32
  }
  func.func @transform_2(%arg0: i32) -> (i32, i32) {
    %c0_i32 = arith.constant 0 : i32
    %c0_i32_0 = arith.constant 0 : i32
    %c0_i32_1 = arith.constant 0 : i32
    return %c0_i32, %c0_i32_0 : i32, i32
  }
  func.func @transform_3(%arg0: i32) -> (i32, i32) {
    %c0_i32 = arith.constant 0 : i32
    %c0_i32_0 = arith.constant 0 : i32
    %c0_i32_1 = arith.constant 0 : i32
    return %c0_i32, %c0_i32_0 : i32, i32
  }
  func.func @transform_4(%arg0: i32) -> (i32, i32) {
    %c0_i32 = arith.constant 0 : i32
    %c0_i32_0 = arith.constant 0 : i32
    %c0_i32_1 = arith.constant 0 : i32
    return %c0_i32, %c0_i32_0 : i32, i32
  }
  func.func @transform_5(%arg0: i32) -> (i32, i32) {
    %c0_i32 = arith.constant 0 : i32
    %c0_i32_0 = arith.constant 0 : i32
    %c0_i32_1 = arith.constant 0 : i32
    return %c0_i32, %c0_i32_0 : i32, i32
  }
  func.func @transform_6(%arg0: i32) -> (i32, i32) {
    %c0_i32 = arith.constant 0 : i32
    %c0_i32_0 = arith.constant 0 : i32
    %c0_i32_1 = arith.constant 0 : i32
    return %c0_i32, %c0_i32_0 : i32, i32
  }
  func.func @transform_7(%arg0: i32) -> (i32, i32) {
    %c0_i32 = arith.constant 0 : i32
    %c0_i32_0 = arith.constant 0 : i32
    %c0_i32_1 = arith.constant 0 : i32
    return %c0_i32, %c0_i32_0 : i32, i32
  }
  func.func @transform_8(%arg0: i32) -> (i32, i32) {
    %c0_i32 = arith.constant 0 : i32
    %c0_i32_0 = arith.constant 0 : i32
    %c0_i32_1 = arith.constant 0 : i32
    return %c0_i32, %c0_i32_0 : i32, i32
  }
  func.func @transform_9(%arg0: i32) -> (i32, i32) {
    %c0_i32 = arith.constant 0 : i32
    %c0_i32_0 = arith.constant 0 : i32
    return %arg0, %c0_i32 : i32, i32
  }
}

</mosaic_0001>

<bundles_post_ra>
// kernel: tpu_custom_call.1
= control target key start
LH: loop header
LB: loop body
LE: loop exit
PB: predicated region body
PF: predicated region fallthrough
CT: control target
= control target key end

     0   :  { %s1576_s0 = inlined_call_operand.hbm [shape: f32[16,128], index: 0, kind: input, shape index: {}]   ;;  %s1577_s1 = inlined_call_operand.vmem [shape: f32[1,128], index: 1, kind: input, shape index: {}]   ;;  %s1578_s2 = inlined_call_operand.hbm [shape: f32[1,128], index: 2, kind: input, shape index: {}]   ;;  %s1579_s3 = inlined_call_operand.hbm [shape: bf16[128,128], index: 3, kind: input, shape index: {}]   ;;  %s1580_s4 = inlined_call_operand.vmem [shape: bf16[1,128], index: 4, kind: input, shape index: {}]   ;;  %s1581_s5 = inlined_call_operand.hbm [shape: bf16[128,256], index: 5, kind: input, shape index: {}]   ;;  %s1582_s6 = inlined_call_operand.vmem [shape: f32[1,256], index: 6, kind: input, shape index: {}]   ;;  %s1583_s7 = inlined_call_operand.vmem [shape: f32[1,256], index: 7, kind: input, shape index: {}]   ;;  %s1584_s8 = inlined_call_operand.vmem [shape: f32[1,256], index: 8, kind: input, shape index: {}]   ;;  %s1585_s9 = inlined_call_operand.hbm [shape: f32[16,256], index: 9, kind: output, shape index: {}]  }
   0x1   :  { %1590 = sst [smem:[#allocation16_spill]] %s1578_s2 }
   0x2   :  { %14 = vsyncpa [#allocation3], 0 }
   0x3   :  { %16 = vsyncpa [#allocation3 + $0x1], 0 }
   0x4   :  { %17 = vsyncpa [#allocation6], 0 }
   0x5   :  { %18 = vsyncpa [#allocation9], 0 }
   0x6   :  { %19 = vsyncpa [#allocation4], 0 }
   0x7   :  { %21 = vsyncpa [#allocation4 + $0x1], 0  ;;  %s1313_s30 = smov 0   ;;  %s1315_s10 = smov 0  }
   0x8   :  { %s1317_s11 = smov 0   ;;  %s1319_s12 = smov 0  }
   0x9 LB: > { %s1334_s13 = sadd.s32 4294967295, %s1249_s12   ;;  %s864_s14 = sadd.s32 4294967294, %s1249_s12   ;;  %s1249_s12 = sphi %s1319_s12, %s1613_s12   ;;  %s1245_s11 = sphi %s1317_s11, %s1612_s11   ;;  %s1241_s10 = sphi %s1315_s10, %s1611_s10   ;;  %s1237_s30 = sphi %s1313_s30, %s1610_s30  }
   0xa   : > { %p47_p0 = scmp.ne.s32.totalorder %s1241_s10, %s1237_s30  ;;  %p1586_p1 = scmp.eq.s32.totalorder %s1334_s13, 0 }
   0xb   : > { %p245_p3 = scmp.eq.s32.totalorder %s864_s14, 1  ;;  %p865_p5 = scmp.ge.s32.totalorder %s1249_s12, 1 }
   0xc   : > { %p1343_p4 = por %p1586_p1, %p47_p0  ;;  %p252_p7 = scmp.lt.s32.totalorder %s1249_s12, 3 }
   0xd   : > { %p1348_p6 = por %p245_p3, %p47_p0  ;;  %s1251_s18 = smov [#allocation5]  }
   0xe   : > { %s1591_s15 = scalar_select %p1343_p4, 1, 0 }
   0xf   : > { %s1592_s16 = scalar_select %p1348_p6, 1, 0 }
  0x10   : > { %p1353_p8 = pnand %p865_p5, %p252_p7  ;;  %s268_s19 = sshll.u32 %s1251_s18, 4  ;;  %s269_s19 = int_to_ptr.vmem [resolvable:$true] %s268_s19 }
  0x11   : > { %1593 = sst [smem:[#allocation15_spill]] %s1592_s16  ;;  %s1252_s20 = smov [#allocation7]  }
  0x12   : > { %s1594_s17 = scalar_select %p1353_p8, 1, 0 }
  0x13   : > { %p955_p10 = pneg %p1353_p8  ;;  %s278_s21 = sshll.u32 %s1252_s20, 4  ;;  %s1366_s21 = int_to_ptr.vmem [resolvable:$true] %s278_s21 }
  0x14   : > { %s1253_s23 = smov [#allocation8]   ;;  %s1596_s2 = sld [smem:[#allocation16_spill]] }
  0x15   : > { %p1362_p11 = pnand %p955_p10, %p1586_p1  ;;  %s1368_s24 = sshll.u32 %s1253_s23, 4  ;;  %s295_s24 = int_to_ptr.vmem [resolvable:$true] %s1368_s24 }
  0x17   : > { %p1378_p13 = pneg %p1362_p11 }
  0x1a   : > { %s1061_s27 = scalar_lea.hbm %s1596_s2, 16 }
  0x1b   : > { %p1062_p12 = scmp.ne.s32.totalorder %s1596_s2, %s1061_s27  ;;  %p1068_p5 = scmp.lt.u32.totalorder %s1061_s27, %s1596_s2 }
  0x1d   : > { %p1064_p0 = pnand %p1378_p13, %p1062_p12 }
  0x1f   : > { %p1065_p3 = pneg %p1064_p0 }
  0x21   : > { %p1070_p7 = pnand %p1068_p5, %p1065_p3 }
  0x23   : > { %1073 = shalt.err (!%p1070_p7)
}
  0x24   : > { %s1074_s23 = scalar_lea.vmem %s269_s19, 16  ;;  %s1081_s25 = scalar_lea.vmem %s269_s19, 32 }
  0x25   : > { %p1075_p10 = scmp.ne.s32.totalorder %s269_s19, %s1074_s23  ;;  %p1082_p2 = scmp.lt.s32.totalorder %s269_s19, %s269_s19 }
  0x26   : > { %p1083_p6 = scmp.lt.s32.totalorder %s1081_s25, %s1074_s23 }
  0x27   : > { %p1077_p9 = pnand %p1075_p10, %p1378_p13 }
  0x28   : > { %p1084_p4 = por %p1083_p6, %p1082_p2 }
  0x29   : > { %p1078_p1 = pneg %p1077_p9 }
  0x2b   : > { %p1085_p8 = pnand %p1084_p4, %p1078_p1 }
  0x2d   : > { %1088 = shalt.err (!%p1085_p8)
}
  0x2e   : > { %958 = dma.hbm_to_vmem [thread:$0]  (!%p1362_p11), %s1596_s2, 16, %s269_s19, [#allocation6]  }
  0x2f   : > { %s1089_s18 = scalar_lea.hbm %s1579_s3, 1024 }
  0x30   : > { %p1090_p9 = scmp.ne.s32.totalorder %s1579_s3, %s1089_s18  ;;  %p1096_p1 = scmp.lt.u32.totalorder %s1089_s18, %s1579_s3 }
  0x32   : > { %p1092_p12 = pnand %p1090_p9, %p1378_p13 }
  0x34   : > { %p1093_p2 = pneg %p1092_p12 }
  0x36   : > { %p1098_p4 = pnand %p1096_p1, %p1093_p2 }
  0x38   : > { %1101 = shalt.err (!%p1098_p4)
}
  0x39   : > { %s1102_s19 = scalar_lea.vmem %s1366_s21, 1024  ;;  %p1110_p3 = scmp.lt.s32.totalorder %s1366_s21, %s1366_s21 }
  0x3a   : > { %p1103_p6 = scmp.ne.s32.totalorder %s1366_s21, %s1102_s19  ;;  %p1111_p5 = scmp.lt.s32.totalorder %s1102_s19, %s1102_s19 }
  0x3c   : > { %p1105_p8 = pnand %p1103_p6, %p1378_p13  ;;  %p1112_p7 = por %p1111_p5, %p1110_p3 }
  0x3e   : > { %p1106_p0 = pneg %p1105_p8 }
  0x40   : > { %p1113_p10 = pnand %p1112_p7, %p1106_p0 }
  0x42   : > { %1116 = shalt.err (!%p1113_p10)
}
  0x43   : > { %s1254_s16 = smov 64   ;;  %s1255_s26 = smov 4  }
  0x44   : > { %961 = dma.hbm_to_vmem [thread:$0]  (!%p1362_p11), %s1579_s3, 1024, %s1366_s21, [#allocation6], %s1254_s16, %s1254_s16, %s1255_s26  }
  0x45   : > { %s1117_s20 = scalar_lea.hbm %s1581_s5, 2048 }
  0x46   : > { %p1118_p9 = scmp.ne.s32.totalorder %s1581_s5, %s1117_s20  ;;  %p1124_p1 = scmp.lt.u32.totalorder %s1117_s20, %s1581_s5 }
  0x48   : > { %p1120_p12 = pnand %p1118_p9, %p1378_p13 }
  0x4a   : > { %p1121_p2 = pneg %p1120_p12 }
  0x4c   : > { %p1126_p4 = pnand %p1124_p1, %p1121_p2 }
  0x4e   : > { %1129 = shalt.err (!%p1126_p4)
}
  0x4f   : > { %s1130_s28 = scalar_lea.vmem %s295_s24, 2048  ;;  %p1138_p3 = scmp.lt.s32.totalorder %s295_s24, %s295_s24 }
  0x50   : > { %p1131_p6 = scmp.ne.s32.totalorder %s295_s24, %s1130_s28  ;;  %p1139_p5 = scmp.lt.s32.totalorder %s1130_s28, %s1130_s28 }
  0x52   : > { %p1133_p8 = pnand %p1131_p6, %p1378_p13  ;;  %p1140_p7 = por %p1139_p5, %p1138_p3 }
  0x54   : > { %p1134_p0 = pneg %p1133_p8 }
  0x56   : > { %p1141_p10 = pnand %p1140_p7, %p1134_p0 }
  0x58   : > { %1144 = shalt.err (!%p1141_p10)
}
  0x59   : > { %s1256_s21 = smov 128   ;;  %s1257_s2 = smov 8  }
  0x5a   : > { %964 = dma.hbm_to_vmem [thread:$0]  (!%p1362_p11), %s1581_s5, 2048, %s295_s24, [#allocation9], %s1256_s21, %s1256_s21, %s1257_s2  }
  0x5b   : > { %s1437_s26 = sadd.s32 1, %s1249_s12   ;;  %s34_s29 = sadd.s32 1, %s1245_s11 }
  0x5c   : > { %s31_s27 = ssub.s32 %s1249_s12, %s1437_s26  ;;  %p41_p9 = scmp.ne.s32.totalorder %s1245_s11, %s1241_s10 }
  0x5d   : > { %p32_p13 = scmp.eq.s32.totalorder %s31_s27, 0  ;;  %p42_p12 = scmp.eq.s32.totalorder %s1249_s12, 0 }
  0x5e   : > { %p976_p2 = scmp.lt.s32.totalorder %s1249_s12, 2  ;;  %p1598_p4 = scmp.eq.s32.totalorder %s1334_s13, 1 }
  0x5f   : > { %s1447_s18 = scalar_select %p32_p13, %s1245_s11, %s34_s29  }
  0x60   : > { %p43_p1 = por %p42_p12, %p41_p9  ;;  %p1451_p6 = por %p1598_p4, %p41_p9 }
  0x61   : > { %s317_s22 = sand.u32 1, %s1245_s11   ;;  %s871_s23 = sshll.u32 %s1249_s12, 7 }
  0x62   : > { %s870_s24 = sshll.u32 %s317_s22, 3  ;;  %s1460_s28 = scalar_lea.hbm %s1576_s0, %s871_s23 }
  0x63   : > { %s321_s21 = scalar_lea.vmem [#allocation2], %s870_s24  ;;  %p1462_p11 = pnand %p976_p2, %p43_p1 }
  0x64   : > { %s328_s2 = sshll.u32 %s321_s21, 4  ;;  %s318_s16 = scalar_lea.sflag [#allocation3], %s317_s22  ;;  %s1466_s2 = int_to_ptr.vmem [resolvable:$true] %s328_s2 }
  0x65   : > { %s1145_s27 = scalar_lea.hbm %s1460_s28, 128  ;;  %p1147_p0 = pneg %p1462_p11 }
  0x66   : > { %p1146_p8 = scmp.ne.s32.totalorder %s1460_s28, %s1145_s27  ;;  %s1150_s24 = scalar_lea.hbm %s1576_s0, 256 }
  0x67   : > { %p1151_p7 = scmp.lt.u32.totalorder %s1460_s28, %s1576_s0  ;;  %p1152_p10 = scmp.lt.u32.totalorder %s1150_s24, %s1145_s27 }
  0x68   : > { %p1148_p3 = pnand %p1147_p0, %p1146_p8  ;;  %p1154_p9 = scmp.lt.u32.totalorder %s1145_s27, %s1460_s28 }
  0x69   : > { %p1153_p13 = por %p1152_p10, %p1151_p7 }
  0x6a   : > { %p1149_p5 = pneg %p1148_p3 }
  0x6b   : > { %p1155_p12 = por %p1154_p9, %p1153_p13 }
  0x6d   : > { %p1156_p2 = pnand %p1155_p12, %p1149_p5 }
  0x6f   : > { %1159 = shalt.err (!%p1156_p2)
}
  0x70   : > { %s1160_s22 = scalar_lea.vmem %s1466_s2, 128  ;;  %s1258_s21 = smov [#allocation2]  }
  0x71   : > { %p1161_p1 = scmp.ne.s32.totalorder %s1466_s2, %s1160_s22  ;;  %s1165_s29 = sshll.u32 %s1258_s21, 4  ;;  %s1166_s29 = int_to_ptr.vmem [resolvable:$false] %s1165_s29 }
  0x72   : > { %s1167_s23 = scalar_lea.vmem %s1166_s29, 256  ;;  %p1168_p3 = scmp.lt.s32.totalorder %s1466_s2, %s1166_s29 }
  0x73   : > { %p1163_p4 = pnand %p1161_p1, %p1147_p0  ;;  %p1169_p7 = scmp.lt.s32.totalorder %s1167_s23, %s1160_s22 }
  0x75   : > { %p1164_p8 = pneg %p1163_p4  ;;  %p1170_p10 = por %p1169_p7, %p1168_p3 }
  0x77   : > { %p1171_p13 = pnand %p1170_p10, %p1164_p8 }
  0x79   : > { %1174 = shalt.err (!%p1171_p13)
}
  0x7a   : > { %968 = dma.hbm_to_vmem [thread:$0]  (!%p1462_p11), %s1460_s28, 128, %s1466_s2, %s318_s16  }
  0x7b   : > { %p1601_p5 = scmp.ne.s32.totalorder %s1594_s17, 0 }
  0x7c   : > { %s1496_s27 = sand.u32 (!%p1601_p5), 1, %s1241_s10   ;;  %p1602_p0 = scmp.ne.s32.totalorder (!%p1601_p5), %s1591_s15, 0 }
  0x7d   : > { %337 = sbr.rel (%p1601_p5) target bundleno = 959 (0x3bf), region = 56  ;;  %s873_s24 = sshll.u32 (!%p1601_p5), %s1496_s27, 3 }
  0x7e   : > { %s340_s25 = scalar_lea.sflag (!%p1601_p5), [#allocation3], %s1496_s27  ;;  %s343_s19 = scalar_lea.vmem (!%p1601_p5), [#allocation2], %s873_s24 }
  0x84   : > { %1220 = dma.done.wait (%p1602_p0), %s340_s25, 128  }
  0x85   : > { %1222 = vsyncadd (%p1602_p0), %s340_s25, 4294967168  ;;  %p1603_p9 = scmp.eq.s32.totalorder %s1334_s13, 0 }
  0x87   : > { %1224 = dma.done.wait (%p1603_p9), [#allocation6], 1040   ;;  %p1604_p11 = pmov %p1603_p9 }
  0x88   : > { %p1605_p12 = pmov %p1603_p9 }
  0x89   : > { %1226 = vsyncadd (%p1604_p11), [#allocation6], 4294966256 }
  0x8a   : > { %1228 = dma.done.wait (%p1605_p12), [#allocation9], 2048   ;;  %p1606_p2 = pmov %p1603_p9 }
  0x8b   : > { %v1259_v0 = vmov 0.0   ;;  %v395_v1 = vld [vmem:[%s343_s19] sm:$0xff]  ;;  %v1023_v3 = vld [vmem:[#allocation7] sm:$0xff]   ;;  %vm1260_vm0 = vmmov 0   ;;  %v879_v23 = vld [vmem:[#allocation5] ss:$0 sm:$0xff]  ;;  %v537_v44 = vlaneseq }
  0x8c   : > { %1230 = vsyncadd (%p1606_p2), [#allocation9], 4294965248  ;;  %919 = vmatprep.subr.bf16.mxu0 %v1259_v0  ;;  %398 = vadd.xlane.f32.xlu0 %v395_v1  ;;  %v402_v2 = vmul.f32 %v395_v1, %v395_v1  ;;  %v1024_v4 = vld [vmem:[#allocation7 + $0x8] sm:$0xff]   ;;  %v1025_v5 = vld [vmem:[#allocation7 + $0x10] sm:$0xff]   ;;  %v1261_v36 = vmov 0   ;;  %s877_s29 = sshll.u32 %s1496_s27, 4 }
  0x8d   : > { %920 = vmatpush3.bf16.msra.mxu0 %v1023_v3  ;;  %v1026_v6 = vld [vmem:[#allocation7 + $0x18] sm:$0xff]   ;;  %v1027_v7 = vld [vmem:[#allocation7 + $0x20] sm:$0xff]   ;;  %935 = vmatprep.mubr.msk.bf16.mxu0 %vm1260_vm0, %v1259_v0  ;;  %v1028_v8 = vld [vmem:[#allocation7 + $0x28] sm:$0xff]   ;;  %v538_v45 = vshrl.u32 %v537_v44, 7  ;;  %s909_s25 = sshll.u32 %s1334_s13, 8  ;;  %s389_s19 = scalar_lea.vmem [#allocation10], %s877_s29 }
  0x8e   : > { %921 = vmatprep.subr.bf16.mxu0 %v1259_v0  ;;  %v1029_v9 = vld [vmem:[#allocation7 + $0x30] sm:$0xff]   ;;  %v1030_v10 = vld [vmem:[#allocation7 + $0x38] sm:$0xff]   ;;  %v878_v19 = vld [vmem:[%s1577_s1] ss:$0 sm:$0xff]  ;;  %691 = vmatprep.mubr.bf16.mxu1 %v1261_v36  ;;  %s765_s15 = sshll.u32 %s389_s19, 4  ;;  %s1532_s2 = scalar_lea.hbm %s1585_s9, %s909_s25  ;;  %s1534_s15 = int_to_ptr.vmem [resolvable:$true] %s765_s15 }
  0x8f   : > { %v1031_v27 = vld [vmem:[#allocation8 + $0x4] ss:$8 sps:$4 sm:$0xff]   ;;  %v1033_v28 = vld [vmem:[#allocation8] ss:$8 sps:$4 sm:$0xff]   ;;  %v1034_v29 = vld [vmem:[#allocation8 + $0x14] ss:$8 sps:$4 sm:$0xff]  }
  0x90   : > { %403 = vadd.xlane.f32.xlu0 %v402_v2  ;;  %659 = vmatprep.subr.bf16.mxu1 %v1031_v27  ;;  %v1036_v30 = vld [vmem:[#allocation8 + $0x10] ss:$8 sps:$4 sm:$0xff]   ;;  %v1037_v31 = vld [vmem:[#allocation8 + $0x24] ss:$8 sps:$4 sm:$0xff]   ;;  %v1039_v32 = vld [vmem:[#allocation8 + $0x20] ss:$8 sps:$4 sm:$0xff]  }
  0x91   : > { %922 = vmatpush3.bf16.msra.mxu0 %v1024_v4  ;;  %660 = vmatpush1.bf16.msra.mxu1 %v1033_v28  ;;  %v1040_v33 = vld [vmem:[#allocation8 + $0x34] ss:$8 sps:$4 sm:$0xff]   ;;  %v1042_v34 = vld [vmem:[#allocation8 + $0x30] ss:$8 sps:$4 sm:$0xff]   ;;  %v1043_v35 = vld [vmem:[#allocation8 + $0x44] ss:$8 sps:$4 sm:$0xff]  }
  0x92   : > { %923 = vmatprep.subr.bf16.mxu0 %v1259_v0  ;;  %661 = vmatprep.subr.bf16.mxu1 %v1034_v29  ;;  %v1045_v37 = vld [vmem:[#allocation8 + $0x40] ss:$8 sps:$4 sm:$0xff]   ;;  %v1046_v38 = vld [vmem:[#allocation8 + $0x54] ss:$8 sps:$4 sm:$0xff]   ;;  %v1048_v39 = vld [vmem:[#allocation8 + $0x50] ss:$8 sps:$4 sm:$0xff]  }
  0x93   : > { %v1049_v40 = vld [vmem:[#allocation8 + $0x64] ss:$8 sps:$4 sm:$0xff]   ;;  %v1051_v41 = vld [vmem:[#allocation8 + $0x60] ss:$8 sps:$4 sm:$0xff]   ;;  %v1052_v42 = vld [vmem:[#allocation8 + $0x74] ss:$8 sps:$4 sm:$0xff]  }
  0x94   : > { %v1054_v43 = vld [vmem:[#allocation8 + $0x70] ss:$8 sps:$4 sm:$0xff]   ;;  %v533_v46 = vld [vmem:[%s1580_s4] sm:$0x1]  ;;  %v539_v48 = vsub.s32 0, %v538_v45  ;;  %v575_v2 = vsub.s32 1, %v538_v45 }
  0x95   : > { %924 = vmatpush3.bf16.msra.mxu0 %v1025_v5  ;;  %662 = vmatpush1.bf16.msra.mxu1 %v1036_v30  ;;  %v535_v47 = vpack.i.b16 %v533_v46, %v533_v46  ;;  %s751_s14 = scalar_lea.sflag [#allocation4], %s1496_s27  ;;  %s1175_s13 = scalar_lea.vmem %s1534_s15, 256 }
  0x96   : > { %925 = vmatprep.subr.bf16.mxu0 %v1259_v0  ;;  %663 = vmatprep.subr.bf16.mxu1 %v1037_v31  ;;  %p1176_p1 = scmp.ne.s32.totalorder %s1534_s15, %s1175_s13  ;;  %s1262_s16 = smov [#allocation10]  }
  0x97   : > { %v540_v49 = vrot.slane %v535_v47, %v539_v48  ;;  %s1179_s22 = sshll.u32 %s1262_s16, 4  ;;  %s1180_s22 = int_to_ptr.vmem [resolvable:$false] %s1179_s22 }
  0x98   : > { %p1177_p4 = pnand %p1176_p1, %p1451_p6  ;;  %s1181_s21 = scalar_lea.vmem %s1180_s22, 512 }
  0x99   : > { %926 = vmatpush3.bf16.msra.mxu0 %v1026_v6  ;;  %664 = vmatpush1.bf16.msra.mxu1 %v1039_v32  ;;  %p1182_p3 = scmp.lt.s32.totalorder %s1534_s15, %s1180_s22  ;;  %p1183_p7 = scmp.lt.s32.totalorder %s1181_s21, %s1175_s13 }
  0x9a   : > { %927 = vmatprep.subr.bf16.mxu0 %v1259_v0  ;;  %665 = vmatprep.subr.bf16.mxu1 %v1040_v33  ;;  %p1178_p8 = pneg %p1177_p4 }
  0x9b   : > { %p1184_p10 = por %p1183_p7, %p1182_p3 }
  0x9d   : > { %928 = vmatpush3.bf16.msra.mxu0 %v1027_v7  ;;  %666 = vmatpush1.bf16.msra.mxu1 %v1042_v34  ;;  %p1185_p13 = pnand %p1184_p10, %p1178_p8 }
  0x9e   : > { %929 = vmatprep.subr.bf16.mxu0 %v1259_v0  ;;  %667 = vmatprep.subr.bf16.mxu1 %v1043_v35 }
  0xa1   : > { %930 = vmatpush3.bf16.msra.mxu0 %v1028_v8  ;;  %668 = vmatpush1.bf16.msra.mxu1 %v1045_v37 }
  0xa2   : > { %931 = vmatprep.subr.bf16.mxu0 %v1259_v0  ;;  %669 = vmatprep.subr.bf16.mxu1 %v1046_v38 }
  0xa5   : > { %932 = vmatpush3.bf16.msra.mxu0 %v1029_v9  ;;  %670 = vmatpush1.bf16.msra.mxu1 %v1048_v39 }
  0xa6   : > { %933 = vmatprep.subr.bf16.mxu0 %v1259_v0  ;;  %671 = vmatprep.subr.bf16.mxu1 %v1049_v40 }
  0xa9   : > { %934 = vmatpush3.bf16.msra.mxu0 %v1030_v10  ;;  %672 = vmatpush1.bf16.msra.mxu1 %v1051_v41 }
  0xaa   : > { %673 = vmatprep.subr.bf16.mxu1 %v1052_v42 }
  0xad   : > { %674 = vmatpush1.bf16.msra.mxu1 %v1054_v43 }
 0x119   : > { %v399_v11 = vpop.xlane.xlu0 %398 }
 0x11a   : > { %v401_v12 = vmul.f32 0.0078125, %v399_v11 }
 0x11c   : > { %v406_v14 = vmul.f32 %v401_v12, %v401_v12  ;;  %v411_v21 = vsub.f32 %v395_v1, %v401_v12  ;;  %v567_v1 = vld [vmem:[%s1582_s6] sm:$0x3] }
 0x11d   : > { %v404_v13 = vpop.xlane.xlu0 %403  ;;  %v572_v3 = vrot.slane %v567_v1, %v539_v48  ;;  %v576_v4 = vrot.slane %v567_v1, %v575_v2 }
 0x11e   : > { %v405_v15 = vmul.f32 0.0078125, %v404_v13 }
 0x120   : > { %v407_v16 = vsub.f32 %v405_v15, %v406_v14 }
 0x122   : > { %v408_v17 = vmax.f32 %v407_v16, 0.0 }
 0x124   : > { %v409_v18 = vadd.f32 1e-05, %v408_v17 }
 0x126   : > { %1055 = vrsqrt.f32 %v409_v18 }
 0x130   : > { %v1056_v20 = vpop.eup %1055 }
 0x131   : > { %v418_v22 = vmul.f32 %v1056_v20, %v878_v19 }
 0x133   : > { %v419_v24 = vmul.f32 %v418_v22, %v411_v21 }
 0x135   : > { %v426_v25 = vadd.f32 %v879_v23, %v419_v24  ;;  %v700_v23 = vld [vmem:[%s1583_s7] sm:$0x3] }
 0x136   : > { %v701_v24 = vld [vmem:[%s1584_s8] sm:$0x3] }
 0x137   : > { %v427_v26 = vpack.c.bf16 %v426_v25, %v426_v25  ;;  %v724_v25 = vrot.slane %v700_v23, %v539_v48  ;;  %v739_v28 = vrot.slane %v701_v24, %v539_v48  ;;  %v743_v29 = vrot.slane %v701_v24, %v575_v2 }
 0x139   : > { %936 = vmatmul.mubr.bf16.vlgmr.msra.gmra.mrb[0].mxu0 %v427_v26  ;;  %v728_v26 = vrot.slane %v700_v23, %v575_v2 }
 0x20c   : > { %v526_v50 = vpop.f32.mrb[0].mxu0 }
 0x20d   : > { %v532_v51 = vpack.c.bf16 %v526_v50, %v526_v50  ;;  %v937_v52 = vpop.f32.mrb[1].mxu0 }
 0x20e   : > { %v529_v53 = vpop.f32.mrb[2].mxu0 }
 0x20f   : > { %v541_v54 = vadd.bf16 %v540_v49, %v532_v51  ;;  %v938_v55 = vpop.f32.mrb[3].mxu0 }
 0x211   : > { %v542_v56 = vmul.bf16 %v541_v54, %v541_v54 }
 0x213   : > { %v543_v57 = vmul.bf16 %v542_v56, %v541_v54 }
 0x215   : > { %v544_v58 = vmul.bf16 1027030327, %v543_v57 }
 0x217   : > { %v545_v59 = vadd.bf16 %v544_v58, %v541_v54 }
 0x219   : > { %v546_v60 = vmul.bf16 1061961548, %v545_v59 }
 0x21b   : > { %1057 = vtanh.bf16 %v546_v60 }
 0x226   : > { %v1058_v61 = vpop.eup %1057 }
 0x227   : > { %v548_v62 = vadd.bf16 1065369472, %v1058_v61 }
 0x229   : > { %v549_v63 = vmul.bf16 1056980736, %v548_v62 }
 0x22b   : > { %v550_v0 = vmul.bf16 %v549_v63, %v541_v54 }
 0x22d   : > { %692 = vmatmul.mubr.bf16.vlgmr.msra.gmra.mrb[0].mxu1 %v550_v0 }
 0x300   : > { %v693_v5 = vpop.f32.mrb[0].mxu1 }
 0x301   : > { %v694_v6 = vadd.f32 %v693_v5, %v572_v3  ;;  %v695_v7 = vpop.f32.mrb[1].mxu1 }
 0x302   : > { %v696_v8 = vadd.f32 %v695_v7, %v576_v4  ;;  %v697_v9 = vpop.f32.mrb[2].mxu1 }
 0x303   : > { %v698_v10 = vpop.f32.mrb[3].mxu1  ;;  %v707_v12 = vmul.f32 %v694_v6, %v694_v6 }
 0x304   : > { %v702_v11 = vadd.f32 %v696_v8, %v694_v6  ;;  %v708_v13 = vmul.f32 %v696_v8, %v696_v8 }
 0x306   : > { %703 = vadd.xlane.f32.xlu1 %v702_v11  ;;  %v709_v14 = vadd.f32 %v708_v13, %v707_v12 }
 0x30a   : > { %710 = vadd.xlane.f32.xlu1 %v709_v14 }
 0x393   : > { %v704_v15 = vpop.xlane.xlu1 %703 }
 0x394   : > { %v706_v16 = vmul.f32 0.00390625, %v704_v15 }
 0x396   : > { %v713_v18 = vmul.f32 %v706_v16, %v706_v16  ;;  %v718_v30 = vsub.f32 %v694_v6, %v706_v16  ;;  %v719_v31 = vsub.f32 %v696_v8, %v706_v16 }
 0x397   : > { %v711_v17 = vpop.xlane.xlu1 %710 }
 0x398   : > { %v712_v19 = vmul.f32 0.00390625, %v711_v17 }
 0x39a   : > { %v714_v20 = vsub.f32 %v712_v19, %v713_v18 }
 0x39c   : > { %v715_v21 = vmax.f32 %v714_v20, 0.0 }
 0x39e   : > { %v716_v22 = vadd.f32 1e-05, %v715_v21 }
 0x3a0   : > { %1059 = vrsqrt.f32 %v716_v22 }
 0x3aa   : > { %v1060_v27 = vpop.eup %1059 }
 0x3ab   : > { %v731_v32 = vmul.f32 %v1060_v27, %v724_v25  ;;  %v732_v33 = vmul.f32 %v1060_v27, %v728_v26 }
 0x3ad   : > { %v733_v34 = vmul.f32 %v731_v32, %v718_v30  ;;  %v734_v35 = vmul.f32 %v732_v33, %v719_v31 }
 0x3af   : > { %v746_v36 = vadd.f32 %v739_v28, %v733_v34  ;;  %v747_v37 = vadd.f32 %v743_v29, %v734_v35 }
 0x3b1   : > { %748 = vst [vmem:[%s389_s19] sm:$0xff] %v746_v36  ;;  %749 = vst [vmem:[%s389_s19 + $0x8] sm:$0xff] %v747_v37 }
 0x3b2   : > { %1188 = shalt.err (!%p1185_p13)
}
 0x3b3   : > { %s1189_s27 = scalar_lea.hbm %s1532_s2, 256  ;;  %s1193_s24 = scalar_lea.hbm %s1585_s9, 512 }
 0x3b4   : > { %p1190_p5 = scmp.ne.s32.totalorder %s1532_s2, %s1189_s27  ;;  %p1194_p11 = scmp.lt.u32.totalorder %s1532_s2, %s1585_s9 }
 0x3b5   : > { %p1195_p12 = scmp.lt.u32.totalorder %s1193_s24, %s1189_s27  ;;  %p1197_p1 = scmp.lt.u32.totalorder %s1189_s27, %s1532_s2 }
 0x3b6   : > { %p1191_p0 = pnand %p1190_p5, %p1451_p6 }
 0x3b7   : > { %p1196_p2 = por %p1195_p12, %p1194_p11 }
 0x3b8   : > { %p1192_p9 = pneg %p1191_p0 }
 0x3b9   : > { %p1198_p4 = por %p1197_p1, %p1196_p2 }
 0x3bb   : > { %p1199_p8 = pnand %p1198_p4, %p1192_p9 }
 0x3bd   : > { %1202 = shalt.err (!%p1199_p8)
}
 0x3be   : > { %953 = dma.vmem_to_hbm [thread:$0]  (%p1451_p6), %s1534_s15, 256, %s1532_s2, %s751_s14  }
 0x3bf PF: > { %s1607_s17 = sld [smem:[#allocation15_spill]]  ;;  %s777_s28 = sand.u32 1, %s1237_s30  }
 0x3c0   : > { %p1609_p7 = scmp.ge.s32.totalorder %s1249_s12, 2  ;;  %s778_s13 = scalar_lea.sflag [#allocation4], %s777_s28 }
 0x3c5   : > { %p1608_p3 = scmp.ne.s32.totalorder %s1607_s17, 0 }
 0x3c7   : > { %p970_p10 = pnand %p1609_p7, %p1608_p3 }
 0x3c9   : > { %1232 = dma.done.wait (!%p970_p10), %s778_s13, 256  }
 0x3ca   : > { %1234 = vsyncadd (!%p970_p10), %s778_s13, 4294967040  ;;  %p24_p13 = scmp.ge.s32.totalorder %s1437_s26, 4   ;;  %s1610_s30 = smov %s1241_s10 }
 0x3cb   : > { %s1611_s10 = smov %s1245_s11  ;;  %s1612_s11 = smov %s1447_s18 }
 0x3cc   : > { %s1613_s12 = smov %s1437_s26  ;;  %26 = sbr.rel (!%p24_p13) target bundleno = 9 (0x9), region = 113 }
 0x3d3   :  { %783 = vsyncpa [#allocation3], 1 }
 0x3d4   :  { %785 = vsyncpa [#allocation3 + $0x1], 1 }
 0x3d5   :  { %786 = vsyncpa [#allocation6], 1 }
 0x3d6   :  { %787 = vsyncpa [#allocation9], 1 }
 0x3d7   :  { %788 = vsyncpa [#allocation4], 1 }
 0x3d8   :  { %790 = vsyncpa [#allocation4 + $0x1], 1 }

// kernel: tpu_custom_call.1
= control target key start
LH: loop header
LB: loop body
LE: loop exit
PB: predicated region body
PF: predicated region fallthrough
CT: control target
= control target key end

     0   :  { %s1576_s0 = inlined_call_operand.hbm [shape: f32[16,128], index: 0, kind: input, shape index: {}]   ;;  %s1577_s1 = inlined_call_operand.vmem [shape: f32[1,128], index: 1, kind: input, shape index: {}]   ;;  %s1578_s2 = inlined_call_operand.hbm [shape: f32[1,128], index: 2, kind: input, shape index: {}]   ;;  %s1579_s3 = inlined_call_operand.hbm [shape: bf16[128,128], index: 3, kind: input, shape index: {}]   ;;  %s1580_s4 = inlined_call_operand.vmem [shape: bf16[1,128], index: 4, kind: input, shape index: {}]   ;;  %s1581_s5 = inlined_call_operand.hbm [shape: bf16[128,256], index: 5, kind: input, shape index: {}]   ;;  %s1582_s6 = inlined_call_operand.vmem [shape: f32[1,256], index: 6, kind: input, shape index: {}]   ;;  %s1583_s7 = inlined_call_operand.vmem [shape: f32[1,256], index: 7, kind: input, shape index: {}]   ;;  %s1584_s8 = inlined_call_operand.vmem [shape: f32[1,256], index: 8, kind: input, shape index: {}]   ;;  %s1585_s9 = inlined_call_operand.hbm [shape: f32[16,256], index: 9, kind: output, shape index: {}]  }
   0x1   :  { %1590 = sst [smem:[#allocation16_spill]] %s1578_s2 }
   0x2   :  { %14 = vsyncpa [#allocation3], 0 }
   0x3   :  { %16 = vsyncpa [#allocation3 + $0x1], 0 }
   0x4   :  { %17 = vsyncpa [#allocation6], 0 }
   0x5   :  { %18 = vsyncpa [#allocation9], 0 }
   0x6   :  { %19 = vsyncpa [#allocation4], 0 }
   0x7   :  { %21 = vsyncpa [#allocation4 + $0x1], 0  ;;  %s1313_s30 = smov 0   ;;  %s1315_s10 = smov 0  }
   0x8   :  { %s1317_s11 = smov 0   ;;  %s1319_s12 = smov 0  }
   0x9 LB: > { %s1334_s13 = sadd.s32 4294967295, %s1249_s12   ;;  %s864_s14 = sadd.s32 4294967294, %s1249_s12   ;;  %s1249_s12 = sphi %s1319_s12, %s1613_s12   ;;  %s1245_s11 = sphi %s1317_s11, %s1612_s11   ;;  %s1241_s10 = sphi %s1315_s10, %s1611_s10   ;;  %s1237_s30 = sphi %s1313_s30, %s1610_s30  }
   0xa   : > { %p47_p0 = scmp.ne.s32.totalorder %s1241_s10, %s1237_s30  ;;  %p1586_p1 = scmp.eq.s32.totalorder %s1334_s13, 0 }
   0xb   : > { %p245_p3 = scmp.eq.s32.totalorder %s864_s14, 1  ;;  %p865_p5 = scmp.ge.s32.totalorder %s1249_s12, 1 }
   0xc   : > { %p1343_p4 = por %p1586_p1, %p47_p0  ;;  %p252_p7 = scmp.lt.s32.totalorder %s1249_s12, 3 }
   0xd   : > { %p1348_p6 = por %p245_p3, %p47_p0  ;;  %s1251_s18 = smov [#allocation5]  }
   0xe   : > { %s1591_s15 = scalar_select %p1343_p4, 1, 0 }
   0xf   : > { %s1592_s16 = scalar_select %p1348_p6, 1, 0 }
  0x10   : > { %p1353_p8 = pnand %p865_p5, %p252_p7  ;;  %s268_s19 = sshll.u32 %s1251_s18, 4  ;;  %s269_s19 = int_to_ptr.vmem [resolvable:$true] %s268_s19 }
  0x11   : > { %1593 = sst [smem:[#allocation15_spill]] %s1592_s16  ;;  %s1252_s20 = smov [#allocation7]  }
  0x12   : > { %s1594_s17 = scalar_select %p1353_p8, 1, 0 }
  0x13   : > { %p955_p10 = pneg %p1353_p8  ;;  %s278_s21 = sshll.u32 %s1252_s20, 4  ;;  %s1366_s21 = int_to_ptr.vmem [resolvable:$true] %s278_s21 }
  0x14   : > { %s1253_s23 = smov [#allocation8]   ;;  %s1596_s2 = sld [smem:[#allocation16_spill]] }
  0x15   : > { %p1362_p11 = pnand %p955_p10, %p1586_p1  ;;  %s1368_s24 = sshll.u32 %s1253_s23, 4  ;;  %s295_s24 = int_to_ptr.vmem [resolvable:$true] %s1368_s24 }
  0x17   : > { %p1378_p13 = pneg %p1362_p11 }
  0x1a   : > { %s1061_s27 = scalar_lea.hbm %s1596_s2, 16 }
  0x1b   : > { %p1062_p12 = scmp.ne.s32.totalorder %s1596_s2, %s1061_s27  ;;  %p1068_p5 = scmp.lt.u32.totalorder %s1061_s27, %s1596_s2 }
  0x1d   : > { %p1064_p0 = pnand %p1378_p13, %p1062_p12 }
  0x1f   : > { %p1065_p3 = pneg %p1064_p0 }
  0x21   : > { %p1070_p7 = pnand %p1068_p5, %p1065_p3 }
  0x23   : > { %1073 = shalt.err (!%p1070_p7)
}
  0x24   : > { %s1074_s23 = scalar_lea.vmem %s269_s19, 16  ;;  %s1081_s25 = scalar_lea.vmem %s269_s19, 32 }
  0x25   : > { %p1075_p10 = scmp.ne.s32.totalorder %s269_s19, %s1074_s23  ;;  %p1082_p2 = scmp.lt.s32.totalorder %s269_s19, %s269_s19 }
  0x26   : > { %p1083_p6 = scmp.lt.s32.totalorder %s1081_s25, %s1074_s23 }
  0x27   : > { %p1077_p9 = pnand %p1075_p10, %p1378_p13 }
  0x28   : > { %p1084_p4 = por %p1083_p6, %p1082_p2 }
  0x29   : > { %p1078_p1 = pneg %p1077_p9 }
  0x2b   : > { %p1085_p8 = pnand %p1084_p4, %p1078_p1 }
  0x2d   : > { %1088 = shalt.err (!%p1085_p8)
}
  0x2e   : > { %958 = dma.hbm_to_vmem [thread:$0]  (!%p1362_p11), %s1596_s2, 16, %s269_s19, [#allocation6]  }
  0x2f   : > { %s1089_s18 = scalar_lea.hbm %s1579_s3, 1024 }
  0x30   : > { %p1090_p9 = scmp.ne.s32.totalorder %s1579_s3, %s1089_s18  ;;  %p1096_p1 = scmp.lt.u32.totalorder %s1089_s18, %s1579_s3 }
  0x32   : > { %p1092_p12 = pnand %p1090_p9, %p1378_p13 }
  0x34   : > { %p1093_p2 = pneg %p1092_p12 }
  0x36   : > { %p1098_p4 = pnand %p1096_p1, %p1093_p2 }
  0x38   : > { %1101 = shalt.err (!%p1098_p4)
}
  0x39   : > { %s1102_s19 = scalar_lea.vmem %s1366_s21, 1024  ;;  %p1110_p3 = scmp.lt.s32.totalorder %s1366_s21, %s1366_s21 }
  0x3a   : > { %p1103_p6 = scmp.ne.s32.totalorder %s1366_s21, %s1102_s19  ;;  %p1111_p5 = scmp.lt.s32.totalorder %s1102_s19, %s1102_s19 }
  0x3c   : > { %p1105_p8 = pnand %p1103_p6, %p1378_p13  ;;  %p1112_p7 = por %p1111_p5, %p1110_p3 }
  0x3e   : > { %p1106_p0 = pneg %p1105_p8 }
  0x40   : > { %p1113_p10 = pnand %p1112_p7, %p1106_p0 }
  0x42   : > { %1116 = shalt.err (!%p1113_p10)
}
  0x43   : > { %s1254_s16 = smov 64   ;;  %s1255_s26 = smov 4  }
  0x44   : > { %961 = dma.hbm_to_vmem [thread:$0]  (!%p1362_p11), %s1579_s3, 1024, %s1366_s21, [#allocation6], %s1254_s16, %s1254_s16, %s1255_s26  }
  0x45   : > { %s1117_s20 = scalar_lea.hbm %s1581_s5, 2048 }
  0x46   : > { %p1118_p9 = scmp.ne.s32.totalorder %s1581_s5, %s1117_s20  ;;  %p1124_p1 = scmp.lt.u32.totalorder %s1117_s20, %s1581_s5 }
  0x48   : > { %p1120_p12 = pnand %p1118_p9, %p1378_p13 }
  0x4a   : > { %p1121_p2 = pneg %p1120_p12 }
  0x4c   : > { %p1126_p4 = pnand %p1124_p1, %p1121_p2 }
  0x4e   : > { %1129 = shalt.err (!%p1126_p4)
}
  0x4f   : > { %s1130_s28 = scalar_lea.vmem %s295_s24, 2048  ;;  %p1138_p3 = scmp.lt.s32.totalorder %s295_s24, %s295_s24 }
  0x50   : > { %p1131_p6 = scmp.ne.s32.totalorder %s295_s24, %s1130_s28  ;;  %p1139_p5 = scmp.lt.s32.totalorder %s1130_s28, %s1130_s28 }
  0x52   : > { %p1133_p8 = pnand %p1131_p6, %p1378_p13  ;;  %p1140_p7 = por %p1139_p5, %p1138_p3 }
  0x54   : > { %p1134_p0 = pneg %p1133_p8 }
  0x56   : > { %p1141_p10 = pnand %p1140_p7, %p1134_p0 }
  0x58   : > { %1144 = shalt.err (!%p1141_p10)
}
  0x59   : > { %s1256_s21 = smov 128   ;;  %s1257_s2 = smov 8  }
  0x5a   : > { %964 = dma.hbm_to_vmem [thread:$0]  (!%p1362_p11), %s1581_s5, 2048, %s295_s24, [#allocation9], %s1256_s21, %s1256_s21, %s1257_s2  }
  0x5b   : > { %s1437_s26 = sadd.s32 1, %s1249_s12   ;;  %s34_s29 = sadd.s32 1, %s1245_s11 }
  0x5c   : > { %s31_s27 = ssub.s32 %s1249_s12, %s1437_s26  ;;  %p41_p9 = scmp.ne.s32.totalorder %s1245_s11, %s1241_s10 }
  0x5d   : > { %p32_p13 = scmp.eq.s32.totalorder %s31_s27, 0  ;;  %p42_p12 = scmp.eq.s32.totalorder %s1249_s12, 0 }
  0x5e   : > { %p976_p2 = scmp.lt.s32.totalorder %s1249_s12, 2  ;;  %p1598_p4 = scmp.eq.s32.totalorder %s1334_s13, 1 }
  0x5f   : > { %s1447_s18 = scalar_select %p32_p13, %s1245_s11, %s34_s29  }
  0x60   : > { %p43_p1 = por %p42_p12, %p41_p9  ;;  %p1451_p6 = por %p1598_p4, %p41_p9 }
  0x61   : > { %s317_s22 = sand.u32 1, %s1245_s11   ;;  %s871_s23 = sshll.u32 %s1249_s12, 7 }
  0x62   : > { %s870_s24 = sshll.u32 %s317_s22, 3  ;;  %s1460_s28 = scalar_lea.hbm %s1576_s0, %s871_s23 }
  0x63   : > { %s321_s21 = scalar_lea.vmem [#allocation2], %s870_s24  ;;  %p1462_p11 = pnand %p976_p2, %p43_p1 }
  0x64   : > { %s328_s2 = sshll.u32 %s321_s21, 4  ;;  %s318_s16 = scalar_lea.sflag [#allocation3], %s317_s22  ;;  %s1466_s2 = int_to_ptr.vmem [resolvable:$true] %s328_s2 }
  0x65   : > { %s1145_s27 = scalar_lea.hbm %s1460_s28, 128  ;;  %p1147_p0 = pneg %p1462_p11 }
  0x66   : > { %p1146_p8 = scmp.ne.s32.totalorder %s1460_s28, %s1145_s27  ;;  %s1150_s24 = scalar_lea.hbm %s1576_s0, 256 }
  0x67   : > { %p1151_p7 = scmp.lt.u32.totalorder %s1460_s28, %s1576_s0  ;;  %p1152_p10 = scmp.lt.u32.totalorder %s1150_s24, %s1145_s27 }
  0x68   : > { %p1148_p3 = pnand %p1147_p0, %p1146_p8  ;;  %p1154_p9 = scmp.lt.u32.totalorder %s1145_s27, %s1460_s28 }
  0x69   : > { %p1153_p13 = por %p1152_p10, %p1151_p7 }
  0x6a   : > { %p1149_p5 = pneg %p1148_p3 }
  0x6b   : > { %p1155_p12 = por %p1154_p9, %p1153_p13 }
  0x6d   : > { %p1156_p2 = pnand %p1155_p12, %p1149_p5 }
  0x6f   : > { %1159 = shalt.err (!%p1156_p2)
}
  0x70   : > { %s1160_s22 = scalar_lea.vmem %s1466_s2, 128  ;;  %s1258_s21 = smov [#allocation2]  }
  0x71   : > { %p1161_p1 = scmp.ne.s32.totalorder %s1466_s2, %s1160_s22  ;;  %s1165_s29 = sshll.u32 %s1258_s21, 4  ;;  %s1166_s29 = int_to_ptr.vmem [resolvable:$false] %s1165_s29 }
  0x72   : > { %s1167_s23 = scalar_lea.vmem %s1166_s29, 256  ;;  %p1168_p3 = scmp.lt.s32.totalorder %s1466_s2, %s1166_s29 }
  0x73   : > { %p1163_p4 = pnand %p1161_p1, %p1147_p0  ;;  %p1169_p7 = scmp.lt.s32.totalorder %s1167_s23, %s1160_s22 }
  0x75   : > { %p1164_p8 = pneg %p1163_p4  ;;  %p1170_p10 = por %p1169_p7, %p1168_p3 }
  0x77   : > { %p1171_p13 = pnand %p1170_p10, %p1164_p8 }
  0x79   : > { %1174 = shalt.err (!%p1171_p13)
}
  0x7a   : > { %968 = dma.hbm_to_vmem [thread:$0]  (!%p1462_p11), %s1460_s28, 128, %s1466_s2, %s318_s16  }
  0x7b   : > { %p1601_p5 = scmp.ne.s32.totalorder %s1594_s17, 0 }
  0x7c   : > { %s1496_s27 = sand.u32 (!%p1601_p5), 1, %s1241_s10   ;;  %p1602_p0 = scmp.ne.s32.totalorder (!%p1601_p5), %s1591_s15, 0 }
  0x7d   : > { %337 = sbr.rel (%p1601_p5) target bundleno = 959 (0x3bf), region = 56  ;;  %s873_s24 = sshll.u32 (!%p1601_p5), %s1496_s27, 3 }
  0x7e   : > { %s340_s25 = scalar_lea.sflag (!%p1601_p5), [#allocation3], %s1496_s27  ;;  %s343_s19 = scalar_lea.vmem (!%p1601_p5), [#allocation2], %s873_s24 }
  0x84   : > { %1220 = dma.done.wait (%p1602_p0), %s340_s25, 128  }
  0x85   : > { %1222 = vsyncadd (%p1602_p0), %s340_s25, 4294967168  ;;  %p1603_p9 = scmp.eq.s32.totalorder %s1334_s13, 0 }
  0x87   : > { %1224 = dma.done.wait (%p1603_p9), [#allocation6], 1040   ;;  %p1604_p11 = pmov %p1603_p9 }
  0x88   : > { %p1605_p12 = pmov %p1603_p9 }
  0x89   : > { %1226 = vsyncadd (%p1604_p11), [#allocation6], 4294966256 }
  0x8a   : > { %1228 = dma.done.wait (%p1605_p12), [#allocation9], 2048   ;;  %p1606_p2 = pmov %p1603_p9 }
  0x8b   : > { %v1259_v0 = vmov 0.0   ;;  %v395_v1 = vld [vmem:[%s343_s19] sm:$0xff]  ;;  %v1023_v3 = vld [vmem:[#allocation7] sm:$0xff]   ;;  %vm1260_vm0 = vmmov 0   ;;  %v879_v23 = vld [vmem:[#allocation5] ss:$0 sm:$0xff]  ;;  %v537_v44 = vlaneseq }
  0x8c   : > { %1230 = vsyncadd (%p1606_p2), [#allocation9], 4294965248  ;;  %919 = vmatprep.subr.bf16.mxu0 %v1259_v0  ;;  %398 = vadd.xlane.f32.xlu0 %v395_v1  ;;  %v402_v2 = vmul.f32 %v395_v1, %v395_v1  ;;  %v1024_v4 = vld [vmem:[#allocation7 + $0x8] sm:$0xff]   ;;  %v1025_v5 = vld [vmem:[#allocation7 + $0x10] sm:$0xff]   ;;  %v1261_v36 = vmov 0   ;;  %s877_s29 = sshll.u32 %s1496_s27, 4 }
  0x8d   : > { %920 = vmatpush3.bf16.msra.mxu0 %v1023_v3  ;;  %v1026_v6 = vld [vmem:[#allocation7 + $0x18] sm:$0xff]   ;;  %v1027_v7 = vld [vmem:[#allocation7 + $0x20] sm:$0xff]   ;;  %935 = vmatprep.mubr.msk.bf16.mxu0 %vm1260_vm0, %v1259_v0  ;;  %v1028_v8 = vld [vmem:[#allocation7 + $0x28] sm:$0xff]   ;;  %v538_v45 = vshrl.u32 %v537_v44, 7  ;;  %s909_s25 = sshll.u32 %s1334_s13, 8  ;;  %s389_s19 = scalar_lea.vmem [#allocation10], %s877_s29 }
  0x8e   : > { %921 = vmatprep.subr.bf16.mxu0 %v1259_v0  ;;  %v1029_v9 = vld [vmem:[#allocation7 + $0x30] sm:$0xff]   ;;  %v1030_v10 = vld [vmem:[#allocation7 + $0x38] sm:$0xff]   ;;  %v878_v19 = vld [vmem:[%s1577_s1] ss:$0 sm:$0xff]  ;;  %691 = vmatprep.mubr.bf16.mxu1 %v1261_v36  ;;  %s765_s15 = sshll.u32 %s389_s19, 4  ;;  %s1532_s2 = scalar_lea.hbm %s1585_s9, %s909_s25  ;;  %s1534_s15 = int_to_ptr.vmem [resolvable:$true] %s765_s15 }
  0x8f   : > { %v1031_v27 = vld [vmem:[#allocation8 + $0x4] ss:$8 sps:$4 sm:$0xff]   ;;  %v1033_v28 = vld [vmem:[#allocation8] ss:$8 sps:$4 sm:$0xff]   ;;  %v1034_v29 = vld [vmem:[#allocation8 + $0x14] ss:$8 sps:$4 sm:$0xff]  }
  0x90   : > { %403 = vadd.xlane.f32.xlu0 %v402_v2  ;;  %659 = vmatprep.subr.bf16.mxu1 %v1031_v27  ;;  %v1036_v30 = vld [vmem:[#allocation8 + $0x10] ss:$8 sps:$4 sm:$0xff]   ;;  %v1037_v31 = vld [vmem:[#allocation8 + $0x24] ss:$8 sps:$4 sm:$0xff]   ;;  %v1039_v32 = vld [vmem:[#allocation8 + $0x20] ss:$8 sps:$4 sm:$0xff]  }
  0x91   : > { %922 = vmatpush3.bf16.msra.mxu0 %v1024_v4  ;;  %660 = vmatpush1.bf16.msra.mxu1 %v1033_v28  ;;  %v1040_v33 = vld [vmem:[#allocation8 + $0x34] ss:$8 sps:$4 sm:$0xff]   ;;  %v1042_v34 = vld [vmem:[#allocation8 + $0x30] ss:$8 sps:$4 sm:$0xff]   ;;  %v1043_v35 = vld [vmem:[#allocation8 + $0x44] ss:$8 sps:$4 sm:$0xff]  }
  0x92   : > { %923 = vmatprep.subr.bf16.mxu0 %v1259_v0  ;;  %661 = vmatprep.subr.bf16.mxu1 %v1034_v29  ;;  %v1045_v37 = vld [vmem:[#allocation8 + $0x40] ss:$8 sps:$4 sm:$0xff]   ;;  %v1046_v38 = vld [vmem:[#allocation8 + $0x54] ss:$8 sps:$4 sm:$0xff]   ;;  %v1048_v39 = vld [vmem:[#allocation8 + $0x50] ss:$8 sps:$4 sm:$0xff]  }
  0x93   : > { %v1049_v40 = vld [vmem:[#allocation8 + $0x64] ss:$8 sps:$4 sm:$0xff]   ;;  %v1051_v41 = vld [vmem:[#allocation8 + $0x60] ss:$8 sps:$4 sm:$0xff]   ;;  %v1052_v42 = vld [vmem:[#allocation8 + $0x74] ss:$8 sps:$4 sm:$0xff]  }
  0x94   : > { %v1054_v43 = vld [vmem:[#allocation8 + $0x70] ss:$8 sps:$4 sm:$0xff]   ;;  %v533_v46 = vld [vmem:[%s1580_s4] sm:$0x1]  ;;  %v539_v48 = vsub.s32 0, %v538_v45  ;;  %v575_v2 = vsub.s32 1, %v538_v45 }
  0x95   : > { %924 = vmatpush3.bf16.msra.mxu0 %v1025_v5  ;;  %662 = vmatpush1.bf16.msra.mxu1 %v1036_v30  ;;  %v535_v47 = vpack.i.b16 %v533_v46, %v533_v46  ;;  %s751_s14 = scalar_lea.sflag [#allocation4], %s1496_s27  ;;  %s1175_s13 = scalar_lea.vmem %s1534_s15, 256 }
  0x96   : > { %925 = vmatprep.subr.bf16.mxu0 %v1259_v0  ;;  %663 = vmatprep.subr.bf16.mxu1 %v1037_v31  ;;  %p1176_p1 = scmp.ne.s32.totalorder %s1534_s15, %s1175_s13  ;;  %s1262_s16 = smov [#allocation10]  }
  0x97   : > { %v540_v49 = vrot.slane %v535_v47, %v539_v48  ;;  %s1179_s22 = sshll.u32 %s1262_s16, 4  ;;  %s1180_s22 = int_to_ptr.vmem [resolvable:$false] %s1179_s22 }
  0x98   : > { %p1177_p4 = pnand %p1176_p1, %p1451_p6  ;;  %s1181_s21 = scalar_lea.vmem %s1180_s22, 512 }
  0x99   : > { %926 = vmatpush3.bf16.msra.mxu0 %v1026_v6  ;;  %664 = vmatpush1.bf16.msra.mxu1 %v1039_v32  ;;  %p1182_p3 = scmp.lt.s32.totalorder %s1534_s15, %s1180_s22  ;;  %p1183_p7 = scmp.lt.s32.totalorder %s1181_s21, %s1175_s13 }
  0x9a   : > { %927 = vmatprep.subr.bf16.mxu0 %v1259_v0  ;;  %665 = vmatprep.subr.bf16.mxu1 %v1040_v33  ;;  %p1178_p8 = pneg %p1177_p4 }
  0x9b   : > { %p1184_p10 = por %p1183_p7, %p1182_p3 }
  0x9d   : > { %928 = vmatpush3.bf16.msra.mxu0 %v1027_v7  ;;  %666 = vmatpush1.bf16.msra.mxu1 %v1042_v34  ;;  %p1185_p13 = pnand %p1184_p10, %p1178_p8 }
  0x9e   : > { %929 = vmatprep.subr.bf16.mxu0 %v1259_v0  ;;  %667 = vmatprep.subr.bf16.mxu1 %v1043_v35 }
  0xa1   : > { %930 = vmatpush3.bf16.msra.mxu0 %v1028_v8  ;;  %668 = vmatpush1.bf16.msra.mxu1 %v1045_v37 }
  0xa2   : > { %931 = vmatprep.subr.bf16.mxu0 %v1259_v0  ;;  %669 = vmatprep.subr.bf16.mxu1 %v1046_v38 }
  0xa5   : > { %932 = vmatpush3.bf16.msra.mxu0 %v1029_v9  ;;  %670 = vmatpush1.bf16.msra.mxu1 %v1048_v39 }
  0xa6   : > { %933 = vmatprep.subr.bf16.mxu0 %v1259_v0  ;;  %671 = vmatprep.subr.bf16.mxu1 %v1049_v40 }
  0xa9   : > { %934 = vmatpush3.bf16.msra.mxu0 %v1030_v10  ;;  %672 = vmatpush1.bf16.msra.mxu1 %v1051_v41 }
  0xaa   : > { %673 = vmatprep.subr.bf16.mxu1 %v1052_v42 }
  0xad   : > { %674 = vmatpush1.bf16.msra.mxu1 %v1054_v43 }
 0x119   : > { %v399_v11 = vpop.xlane.xlu0 %398 }
 0x11a   : > { %v401_v12 = vmul.f32 0.0078125, %v399_v11 }
 0x11c   : > { %v406_v14 = vmul.f32 %v401_v12, %v401_v12  ;;  %v411_v21 = vsub.f32 %v395_v1, %v401_v12  ;;  %v567_v1 = vld [vmem:[%s1582_s6] sm:$0x3] }
 0x11d   : > { %v404_v13 = vpop.xlane.xlu0 %403  ;;  %v572_v3 = vrot.slane %v567_v1, %v539_v48  ;;  %v576_v4 = vrot.slane %v567_v1, %v575_v2 }
 0x11e   : > { %v405_v15 = vmul.f32 0.0078125, %v404_v13 }
 0x120   : > { %v407_v16 = vsub.f32 %v405_v15, %v406_v14 }
 0x122   : > { %v408_v17 = vmax.f32 %v407_v16, 0.0 }
 0x124   : > { %v409_v18 = vadd.f32 1e-05, %v408_v17 }
 0x126   : > { %1055 = vrsqrt.f32 %v409_v18 }
 0x130   : > { %v1056_v20 = vpop.eup %1055 }
 0x131   : > { %v418_v22 = vmul.f32 %v1056_v20, %v878_v19 }
 0x133   : > { %v419_v24 = vmul.f32 %v418_v22, %v411_v21 }
 0x135   : > { %v426_v25 = vadd.f32 %v879_v23, %v419_v24  ;;  %v700_v23 = vld [vmem:[%s1583_s7] sm:$0x3] }
 0x136   : > { %v701_v24 = vld [vmem:[%s1584_s8] sm:$0x3] }
 0x137   : > { %v427_v26 = vpack.c.bf16 %v426_v25, %v426_v25  ;;  %v724_v25 = vrot.slane %v700_v23, %v539_v48  ;;  %v739_v28 = vrot.slane %v701_v24, %v539_v48  ;;  %v743_v29 = vrot.slane %v701_v24, %v575_v2 }
 0x139   : > { %936 = vmatmul.mubr.bf16.vlgmr.msra.gmra.mrb[0].mxu0 %v427_v26  ;;  %v728_v26 = vrot.slane %v700_v23, %v575_v2 }
 0x20c   : > { %v526_v50 = vpop.f32.mrb[0].mxu0 }
 0x20d   : > { %v532_v51 = vpack.c.bf16 %v526_v50, %v526_v50  ;;  %v937_v52 = vpop.f32.mrb[1].mxu0 }
 0x20e   : > { %v529_v53 = vpop.f32.mrb[2].mxu0 }
 0x20f   : > { %v541_v54 = vadd.bf16 %v540_v49, %v532_v51  ;;  %v938_v55 = vpop.f32.mrb[3].mxu0 }
 0x211   : > { %v542_v56 = vmul.bf16 %v541_v54, %v541_v54 }
 0x213   : > { %v543_v57 = vmul.bf16 %v542_v56, %v541_v54 }
 0x215   : > { %v544_v58 = vmul.bf16 1027030327, %v543_v57 }
 0x217   : > { %v545_v59 = vadd.bf16 %v544_v58, %v541_v54 }
 0x219   : > { %v546_v60 = vmul.bf16 1061961548, %v545_v59 }
 0x21b   : > { %1057 = vtanh.bf16 %v546_v60 }
 0x226   : > { %v1058_v61 = vpop.eup %1057 }
 0x227   : > { %v548_v62 = vadd.bf16 1065369472, %v1058_v61 }
 0x229   : > { %v549_v63 = vmul.bf16 1056980736, %v548_v62 }
 0x22b   : > { %v550_v0 = vmul.bf16 %v549_v63, %v541_v54 }
 0x22d   : > { %692 = vmatmul.mubr.bf16.vlgmr.msra.gmra.mrb[0].mxu1 %v550_v0 }
 0x300   : > { %v693_v5 = vpop.f32.mrb[0].mxu1 }
 0x301   : > { %v694_v6 = vadd.f32 %v693_v5, %v572_v3  ;;  %v695_v7 = vpop.f32.mrb[1].mxu1 }
 0x302   : > { %v696_v8 = vadd.f32 %v695_v7, %v576_v4  ;;  %v697_v9 = vpop.f32.mrb[2].mxu1 }
 0x303   : > { %v698_v10 = vpop.f32.mrb[3].mxu1  ;;  %v707_v12 = vmul.f32 %v694_v6, %v694_v6 }
 0x304   : > { %v702_v11 = vadd.f32 %v696_v8, %v694_v6  ;;  %v708_v13 = vmul.f32 %v696_v8, %v696_v8 }
 0x306   : > { %703 = vadd.xlane.f32.xlu1 %v702_v11  ;;  %v709_v14 = vadd.f32 %v708_v13, %v707_v12 }
 0x30a   : > { %710 = vadd.xlane.f32.xlu1 %v709_v14 }
 0x393   : > { %v704_v15 = vpop.xlane.xlu1 %703 }
 0x394   : > { %v706_v16 = vmul.f32 0.00390625, %v704_v15 }
 0x396   : > { %v713_v18 = vmul.f32 %v706_v16, %v706_v16  ;;  %v718_v30 = vsub.f32 %v694_v6, %v706_v16  ;;  %v719_v31 = vsub.f32 %v696_v8, %v706_v16 }
 0x397   : > { %v711_v17 = vpop.xlane.xlu1 %710 }
 0x398   : > { %v712_v19 = vmul.f32 0.00390625, %v711_v17 }
 0x39a   : > { %v714_v20 = vsub.f32 %v712_v19, %v713_v18 }
 0x39c   : > { %v715_v21 = vmax.f32 %v714_v20, 0.0 }
 0x39e   : > { %v716_v22 = vadd.f32 1e-05, %v715_v21 }
 0x3a0   : > { %1059 = vrsqrt.f32 %v716_v22 }
 0x3aa   : > { %v1060_v27 = vpop.eup %1059 }
 0x3ab   : > { %v731_v32 = vmul.f32 %v1060_v27, %v724_v25  ;;  %v732_v33 = vmul.f32 %v1060_v27, %v728_v26 }
 0x3ad   : > { %v733_v34 = vmul.f32 %v731_v32, %v718_v30  ;;  %v734_v35 = vmul.f32 %v732_v33, %v719_v31 }
 0x3af   : > { %v746_v36 = vadd.f32 %v739_v28, %v733_v34  ;;  %v747_v37 = vadd.f32 %v743_v29, %v734_v35 }
 0x3b1   : > { %748 = vst [vmem:[%s389_s19] sm:$0xff] %v746_v36  ;;  %749 = vst [vmem:[%s389_s19 + $0x8] sm:$0xff] %v747_v37 }
 0x3b2   : > { %1188 = shalt.err (!%p1185_p13)
}
 0x3b3   : > { %s1189_s27 = scalar_lea.hbm %s1532_s2, 256  ;;  %s1193_s24 = scalar_lea.hbm %s1585_s9, 512 }
 0x3b4   : > { %p1190_p5 = scmp.ne.s32.totalorder %s1532_s2, %s1189_s27  ;;  %p1194_p11 = scmp.lt.u32.totalorder %s1532_s2, %s1585_s9 }
 0x3b5   : > { %p1195_p12 = scmp.lt.u32.totalorder %s1193_s24, %s1189_s27  ;;  %p1197_p1 = scmp.lt.u32.totalorder %s1189_s27, %s1532_s2 }
 0x3b6   : > { %p1191_p0 = pnand %p1190_p5, %p1451_p6 }
 0x3b7   : > { %p1196_p2 = por %p1195_p12, %p1194_p11 }
 0x3b8   : > { %p1192_p9 = pneg %p1191_p0 }
 0x3b9   : > { %p1198_p4 = por %p1197_p1, %p1196_p2 }
 0x3bb   : > { %p1199_p8 = pnand %p1198_p4, %p1192_p9 }
 0x3bd   : > { %1202 = shalt.err (!%p1199_p8)
}
 0x3be   : > { %953 = dma.vmem_to_hbm [thread:$0]  (%p1451_p6), %s1534_s15, 256, %s1532_s2, %s751_s14  }
 0x3bf PF: > { %s1607_s17 = sld [smem:[#allocation15_spill]]  ;;  %s777_s28 = sand.u32 1, %s1237_s30  }
 0x3c0   : > { %p1609_p7 = scmp.ge.s32.totalorder %s1249_s12, 2  ;;  %s778_s13 = scalar_lea.sflag [#allocation4], %s777_s28 }
 0x3c5   : > { %p1608_p3 = scmp.ne.s32.totalorder %s1607_s17, 0 }
 0x3c7   : > { %p970_p10 = pnand %p1609_p7, %p1608_p3 }
 0x3c9   : > { %1232 = dma.done.wait (!%p970_p10), %s778_s13, 256  }
 0x3ca   : > { %1234 = vsyncadd (!%p970_p10), %s778_s13, 4294967040  ;;  %p24_p13 = scmp.ge.s32.totalorder %s1437_s26, 4   ;;  %s1610_s30 = smov %s1241_s10 }
 0x3cb   : > { %s1611_s10 = smov %s1245_s11  ;;  %s1612_s11 = smov %s1447_s18 }
 0x3cc   : > { %s1613_s12 = smov %s1437_s26  ;;  %26 = sbr.rel (!%p24_p13) target bundleno = 9 (0x9), region = 113 }
 0x3d3   :  { %783 = vsyncpa [#allocation3], 1 }
 0x3d4   :  { %785 = vsyncpa [#allocation3 + $0x1], 1 }
 0x3d5   :  { %786 = vsyncpa [#allocation6], 1 }
 0x3d6   :  { %787 = vsyncpa [#allocation9], 1 }
 0x3d7   :  { %788 = vsyncpa [#allocation4], 1 }
 0x3d8   :  { %790 = vsyncpa [#allocation4 + $0x1], 1 }

</bundles_post_ra>
